<compile_context>
chip_gen: v6e
topology: v6e:2x2x1
jax: 0.10.0
libtpu: 0.0.40
codegen_flags: <defaults>
</compile_context>

<pallas_src>
import functools

import jax
import jax.numpy as jnp
import numpy as np
from jax.experimental import pallas as pl
from jax.experimental.pallas import tpu as pltpu

LANE = 128  # padded label dim (lane-dense logits / classifier N)


# ----------------------------- Pallas kernel --------------------------------
def _bert_head_kernel(
    xbl_ref,        # (TB, S, H+E)  bf16   concat(bert, laser)
    elmo_ref,       # (TB, S, E)    bf16
    w_eh_ref,       # (H+E, H)      bf16   shared elmo2hidden weight (transposed)
    b_eh_ref,       # (1, H)        f32
    wih_ref,        # (H, 8R)       bf16   [fwd i,f,o,g | bwd i,f,o,g]
    whh_ref,        # (R, 8R)       f32    [Whh_f^T | Whh_b^T]
    b_g_ref,        # (1, 8R)       f32    folded (b_ih + b_hh), both directions
    wtag_f_ref,     # (R, Lp)       bf16
    wtag_b_ref,     # (R, Lp)       bf16
    btag_ref,       # (1, Lp)       f32    zero-padded past L
    cw_ref,         # (1, Lp)       f32    class weights, zero-padded past L
    mask_ref,       # (TB, S, 1)    int32
    labels_ref,     # (TB, S, 1)    int32
    logits_ref,     # (TB, S, Lp)   f32
    num_ref,        # (1, 1, 1)     f32    per-tile weighted NLL sum
    den_ref,        # (1, 1, 1)     f32    per-tile weight sum
    *,
    num_labels,
):
    f32 = jnp.float32
    bf16 = jnp.bfloat16
    TB, S, HE = xbl_ref.shape
    H = w_eh_ref.shape[1]
    E = elmo_ref.shape[2]
    R = whh_ref.shape[0]
    G4 = 4 * R
    Lp = wtag_f_ref.shape[1]
    L = num_labels

    # ---- shared elmo2hidden projection applied twice (concat folded) -------
    xbl2d = xbl_ref[...].reshape(TB * S, HE)
    elmo2d = elmo_ref[...].reshape(TB * S, E)
    w_eh = w_eh_ref[...]
    b_eh = b_eh_ref[...]
    h1 = jnp.dot(xbl2d, w_eh, preferred_element_type=f32) + b_eh        # (TB*S, H)
    x2 = jnp.concatenate([h1.astype(bf16), elmo2d], axis=1)             # (TB*S, H+E)
    end2d = jnp.dot(x2, w_eh, preferred_element_type=f32) + b_eh        # (TB*S, H)

    # time-major layout so each timestep is a contiguous row block
    if TB == 1:
        end_t = end2d
    else:
        end_t = jnp.transpose(end2d.reshape(TB, S, H), (1, 0, 2)).reshape(S * TB, H)

    # ---- all LSTM input projections hoisted out of the recurrence ----------
    # columns: [fwd i,f,o,g | bwd i,f,o,g]; biases folded in.
    pre = (jnp.dot(end_t.astype(bf16), wih_ref[...],
                   preferred_element_type=f32) + b_g_ref[...])          # (S*TB, 8R)

    whh = whh_ref[...]                                                  # (R, 8R) f32
    # stacked state: rows [:TB] = forward chain, rows [TB:] = backward chain
    hh = jnp.zeros((2 * TB, R), f32)
    cc = jnp.zeros((2 * TB, R), f32)
    outs_f = [None] * S
    outs_b = [None] * S
    # Forward chain walks t while the independent backward chain walks S-1-t;
    # one recurrent matmul + one sigmoid + one tanh push per step.
    for t in range(S):
        tb = S - 1 - t
        gin_f = pre[t * TB:(t + 1) * TB, 0:G4]
        gin_b = pre[tb * TB:(tb + 1) * TB, G4:2 * G4]
        rec = jnp.dot(hh, whh, preferred_element_type=f32)              # (2TB, 8R)
        gates = (jnp.concatenate([gin_f, gin_b], axis=0)
                 + jnp.concatenate([rec[:TB, 0:G4], rec[TB:, G4:2 * G4]], axis=0))
        sig = jax.nn.sigmoid(gates[:, 0:3 * R])      # i, f, o in one EUP pass
        g = jnp.tanh(gates[:, 3 * R:G4])
        i_g = sig[:, 0:R]
        f_g = sig[:, R:2 * R]
        o_g = sig[:, 2 * R:3 * R]
        cc = f_g * cc + i_g * g
        hh = o_g * jnp.tanh(cc)
        outs_f[t] = hh[:TB]
        outs_b[tb] = hh[TB:]

    lstm_f = jnp.concatenate(outs_f, axis=0)                            # (S*TB, R)
    lstm_b = jnp.concatenate(outs_b, axis=0)                            # (S*TB, R)

    # ---- classifier (lane-dense: num_labels padded to 128) ------------------
    logits_t = (jnp.dot(lstm_f.astype(bf16), wtag_f_ref[...],
                        preferred_element_type=f32)
                + jnp.dot(lstm_b.astype(bf16), wtag_b_ref[...],
                          preferred_element_type=f32)
                + btag_ref[...])                                        # (S*TB, Lp)
    if TB == 1:
        logits_bt = logits_t.reshape(TB, S, Lp)
    else:
        logits_bt = jnp.transpose(logits_t.reshape(S, TB, Lp), (1, 0, 2))
    # dropout2(p=0.1) is identity in eval mode.
    logits_ref[...] = logits_bt

    # ---- class-weighted masked CrossEntropyLoss: per-tile partial sums ------
    x = logits_bt.reshape(TB * S, Lp)
    cls = jax.lax.broadcasted_iota(jnp.int32, (TB * S, Lp), 1)
    valid = cls < L                                                     # mask padded classes
    m = jnp.max(jnp.where(valid, x, -jnp.inf), axis=-1, keepdims=True)
    e = jnp.where(valid, jnp.exp(x - m), 0.0)
    logp = (x - m) - jnp.log(jnp.sum(e, axis=-1, keepdims=True))
    lab = labels_ref[...].reshape(TB * S, 1)
    onehot = (lab == cls).astype(f32)
    nll = -jnp.sum(onehot * logp, axis=-1, keepdims=True)               # (TB*S, 1)
    w_tok = jnp.sum(onehot * cw_ref[...], axis=-1, keepdims=True)       # (TB*S, 1)
    active = (mask_ref[...].reshape(TB * S, 1) == 1).astype(f32)
    num_ref[...] = jnp.sum(active * w_tok * nll).reshape(1, 1, 1)
    den_ref[...] = jnp.sum(active * w_tok).reshape(1, 1, 1)


# --------------------------------- wrapper ----------------------------------
def bert_class_forward(ids, mask, labels, params, *, batch_tile=1):
    """Mirrors BERTClass.forward(ids, mask, labels) -> (loss, logits)."""
    B, S = ids.shape
    H = params["emb"].shape[1]
    E = params["elmo_table"].shape[1]
    R = params["w_hh_f"].shape[1]
    L = params["w_tag"].shape[0]
    Lp = LANE
    TB = batch_tile
    assert B % TB == 0
    G = B // TB
    f32, bf16 = jnp.float32, jnp.bfloat16

    # TODO(synk): pretrained BertModel encoder replaced by a deterministic
    # embedding lookup (no checkpoint loading in this synthetic kernel).
    bert_out = params["emb"][ids].astype(f32)                           # (B,S,H)
    # TODO(synk): external LASER sentence encoder stub; one vector per sentence
    # then zero-padded along seq, exactly as in the torch forward.
    laser_sent = jnp.tanh(jnp.mean(bert_out, axis=1))                   # (B,E)
    laser = jnp.concatenate(
        [laser_sent[:, None, :], jnp.zeros((B, S - 1, E), f32)], axis=1)
    # TODO(synk): pretrained ELMo embedder stub (deterministic table lookup).
    elmo = jnp.tanh(params["elmo_table"][ids]).astype(f32)              # (B,S,E)

    # bf16 activations feeding the MXU (f32 accumulation inside the kernel).
    x_bl = jnp.concatenate([bert_out, laser], axis=-1).astype(bf16)     # (B,S,H+E)
    elmo_bf = elmo.astype(bf16)

    def reorder(w):  # torch LSTM gate order (i, f, g, o) -> (i, f, o, g)
        return jnp.concatenate([w[:2 * R], w[3 * R:], w[2 * R:3 * R]], axis=0)

    w_eh_t = params["w_eh"].T.astype(bf16)                              # (H+E, H)
    b_eh = params["b_eh"].reshape(1, H).astype(f32)

    wih_cat = jnp.concatenate(
        [reorder(params["w_ih_f"]).T, reorder(params["w_ih_b"]).T],
        axis=1).astype(bf16)                                            # (H, 8R)
    whh_cat = jnp.concatenate(
        [reorder(params["w_hh_f"]).T, reorder(params["w_hh_b"]).T],
        axis=1).astype(f32)                                             # (R, 8R)
    b_g = jnp.concatenate(
        [reorder(params["b_ih_f"] + params["b_hh_f"]),
         reorder(params["b_ih_b"] + params["b_hh_b"])]).reshape(1, 8 * R).astype(f32)

    w_tag_t = jnp.pad(params["w_tag"].T, ((0, 0), (0, Lp - L)))         # (2R, Lp)
    w_tag_f = w_tag_t[:R].astype(bf16)
    w_tag_b = w_tag_t[R:].astype(bf16)
    b_tag = jnp.pad(params["b_tag"], (0, Lp - L)).reshape(1, Lp).astype(f32)
    cw = jnp.pad(params["class_weights"], (0, Lp - L)).reshape(1, Lp).astype(f32)

    mask3 = mask.reshape(B, S, 1).astype(jnp.int32)
    labels3 = labels.reshape(B, S, 1).astype(jnp.int32)

    def tile_spec(shape):  # batch-tiled along the leading dim
        nrest = len(shape) - 1
        return pl.BlockSpec((TB,) + tuple(shape[1:]),
                            lambda i, nrest=nrest: (i,) + (0,) * nrest)

    def full_spec(shape):  # whole-array-resident weights
        nd = len(shape)
        return pl.BlockSpec(tuple(shape), lambda i, nd=nd: (0,) * nd)

    inputs = (x_bl, elmo_bf, w_eh_t, b_eh, wih_cat, whh_cat, b_g,
              w_tag_f, w_tag_b, b_tag, cw, mask3, labels3)
    in_specs = [
        tile_spec(x_bl.shape), tile_spec(elmo_bf.shape),
        full_spec(w_eh_t.shape), full_spec(b_eh.shape),
        full_spec(wih_cat.shape), full_spec(whh_cat.shape), full_spec(b_g.shape),
        full_spec(w_tag_f.shape), full_spec(w_tag_b.shape),
        full_spec(b_tag.shape), full_spec(cw.shape),
        tile_spec(mask3.shape), tile_spec(labels3.shape),
    ]

    logits_pad, num, den = pl.pallas_call(
        functools.partial(_bert_head_kernel, num_labels=L),
        out_shape=(
            jax.ShapeDtypeStruct((B, S, Lp), f32),
            jax.ShapeDtypeStruct((G, 1, 1), f32),
            jax.ShapeDtypeStruct((G, 1, 1), f32),
        ),
        grid=(G,),
        in_specs=in_specs,
        out_specs=(
            pl.BlockSpec((TB, S, Lp), lambda i: (i, 0, 0)),
            pl.BlockSpec((1, 1, 1), lambda i: (i, 0, 0)),
            pl.BlockSpec((1, 1, 1), lambda i: (i, 0, 0)),
        ),
        compiler_params=pltpu.CompilerParams(
            dimension_semantics=("parallel",),
            vmem_limit_bytes=64 * 1024 * 1024),
    )(*inputs)

    num_sum = jnp.sum(num)
    den_sum = jnp.sum(den)
    # Guard against an all-padding batch (torch would produce NaN here).
    loss = jnp.where(den_sum > 0,
                     num_sum / jnp.where(den_sum > 0, den_sum, 1.0), 0.0)
    logits = logits_pad[..., :L]
    return loss, logits, x_bl, elmo_bf


# --------------------------- pure-JAX reference ------------------------------
def _ref_forward(params, x_bl, elmo, mask, labels):
    f32 = jnp.float32
    x_bl = x_bl.astype(f32)
    elmo = elmo.astype(f32)
    B, S, _ = x_bl.shape
    R = params["w_hh_f"].shape[1]
    L = params["w_tag"].shape[0]

    def rb(w):  # emulate the kernel's bf16 weight storage
        return w.astype(jnp.bfloat16).astype(f32)

    w_eh = rb(params["w_eh"])
    b_eh = params["b_eh"]
    h1 = x_bl @ w_eh.T + b_eh
    end = jnp.concatenate([h1, elmo], axis=-1) @ w_eh.T + b_eh

    def run_lstm(x, wih, whh, bih, bhh, reverse):
        wih = rb(wih)
        h = jnp.zeros((B, R)); c = jnp.zeros((B, R))
        outs = [None] * S
        ts = range(S - 1, -1, -1) if reverse else range(S)
        for t in ts:
            g = x[:, t, :] @ wih.T + h @ whh.T + bih + bhh
            i = jax.nn.sigmoid(g[:, :R]); f = jax.nn.sigmoid(g[:, R:2 * R])
            gg = jnp.tanh(g[:, 2 * R:3 * R]); o = jax.nn.sigmoid(g[:, 3 * R:])
            c = f * c + i * gg
            h = o * jnp.tanh(c)
            outs[t] = h
        return jnp.stack(outs, axis=1)

    fwd = run_lstm(end, params["w_ih_f"], params["w_hh_f"],
                   params["b_ih_f"], params["b_hh_f"], False)
    bwd = run_lstm(end, params["w_ih_b"], params["w_hh_b"],
                   params["b_ih_b"], params["b_hh_b"], True)
    lstm_out = jnp.concatenate([fwd, bwd], axis=-1)
    logits = lstm_out @ rb(params["w_tag"]).T + params["b_tag"]

    logp = jax.nn.log_softmax(logits, axis=-1).reshape(-1, L)
    lab = labels.reshape(-1)
    msk = (mask.reshape(-1) == 1)
    nll = -logp[jnp.arange(lab.shape[0]), lab]
    w = params["class_weights"][lab]
    num = jnp.sum(jnp.where(msk, w * nll, 0.0))
    den = jnp.sum(jnp.where(msk, w, 0.0))
    return num / den, logits


# ----------------------------------- main ------------------------------------
if __name__ == "__main__":
    B, S, H = 2, 8, 32          # batch, seq, bert hidden_size
    EXTRA = 32                  # laser/elmo feature dim (elmo_dim * elmo_layers)
    R = 16                      # LSTM rnn_dim per direction
    L = 5                       # num_labels
    VOCAB = 30

    key = jax.random.PRNGKey(0)
    ks = jax.random.split(key, 16)
    s = 0.1
    params = {
        "emb":        jax.random.normal(ks[0], (VOCAB, H), jnp.float32) * s,
        "elmo_table": jax.random.normal(ks[1], (VOCAB, EXTRA), jnp.float32) * s,
        "w_eh":       jax.random.normal(ks[2], (H, H + EXTRA), jnp.float32) * s,
        "b_eh":       jax.random.normal(ks[3], (H,), jnp.float32) * s,
        "w_ih_f":     jax.random.normal(ks[4], (4 * R, H), jnp.float32) * s,
        "w_hh_f":     jax.random.normal(ks[5], (4 * R, R), jnp.float32) * s,
        "b_ih_f":     jax.random.normal(ks[6], (4 * R,), jnp.float32) * s,
        "b_hh_f":     jax.random.normal(ks[7], (4 * R,), jnp.float32) * s,
        "w_ih_b":     jax.random.normal(ks[8], (4 * R, H), jnp.float32) * s,
        "w_hh_b":     jax.random.normal(ks[9], (4 * R, R), jnp.float32) * s,
        "b_ih_b":     jax.random.normal(ks[10], (4 * R,), jnp.float32) * s,
        "b_hh_b":     jax.random.normal(ks[11], (4 * R,), jnp.float32) * s,
        "w_tag":      jax.random.normal(ks[12], (L, 2 * R), jnp.float32) * s,
        "b_tag":      jax.random.normal(ks[13], (L,), jnp.float32) * s,
    }
    cw = jnp.arange(1, L + 1, dtype=jnp.float32)
    params["class_weights"] = cw / jnp.sum(cw)   # stand-in for get_class_weights_new()

    ids = jax.random.randint(ks[14], (B, S), 0, VOCAB, dtype=jnp.int32)
    labels = jax.random.randint(ks[15], (B, S), 0, L, dtype=jnp.int32)
    mask = jnp.ones((B, S), jnp.int32).at[1, S - 2:].set(0)   # a couple of pad tokens

    # batch_tile=1 -> grid=(2,) exercising the batch-parallel grid and the
    # per-tile loss reduction; at real sizes pick batch_tile >= 8 within VMEM.
    loss, logits, x_bl, elmo_bf = bert_class_forward(
        ids, mask, labels, params, batch_tile=1)
    jax.block_until_ready((loss, logits))

    ref_loss, ref_logits = _ref_forward(params, x_bl, elmo_bf, mask, labels)
    # tolerance sized for bf16 matmul inputs (f32 accumulation)
    np.testing.assert_allclose(np.asarray(logits), np.asarray(ref_logits),
                               rtol=5e-3, atol=5e-3)
    np.testing.assert_allclose(float(loss), float(ref_loss), rtol=5e-3, atol=5e-3)

    print("KERNEL_OK")
</pallas_src>

<mosaic_0001>
module attributes {stable_mosaic.version = 11 : i64} {
  func.func @_bert_head_kernel(%arg0: i32, %arg1: memref<1x8x64xbf16, #tpu.memory_space<vmem>>, %arg2: memref<1x8x32xbf16, #tpu.memory_space<vmem>>, %arg3: memref<64x32xbf16, #tpu.memory_space<vmem>>, %arg4: memref<1x32xf32, #tpu.memory_space<vmem>>, %arg5: memref<32x128xbf16, #tpu.memory_space<vmem>>, %arg6: memref<16x128xf32, #tpu.memory_space<vmem>>, %arg7: memref<1x128xf32, #tpu.memory_space<vmem>>, %arg8: memref<16x128xbf16, #tpu.memory_space<vmem>>, %arg9: memref<16x128xbf16, #tpu.memory_space<vmem>>, %arg10: memref<1x128xf32, #tpu.memory_space<vmem>>, %arg11: memref<1x128xf32, #tpu.memory_space<vmem>>, %arg12: memref<1x8x1xi32, #tpu.memory_space<vmem>>, %arg13: memref<1x8x1xi32, #tpu.memory_space<vmem>>, %arg14: memref<1x8x128xf32, #tpu.memory_space<vmem>>, %arg15: memref<1x1x1xf32, #tpu.memory_space<vmem>>, %arg16: memref<1x1x1xf32, #tpu.memory_space<vmem>>) attributes {dimension_semantics = [#tpu.dimension_semantics<parallel>], iteration_bounds = array<i64: 2>, scalar_prefetch = 0 : i64, scratch_operands = 0 : i64, tpu.core_type = #tpu.core_type<tc>, window_params = [{transform_indices = @transform_0, window_bounds = array<i64: 1, 8, 64>}, {transform_indices = @transform_1, window_bounds = array<i64: 1, 8, 32>}, {pipeline_mode = #tpu.pipeline_mode<synchronous>, transform_indices = @transform_2, window_bounds = array<i64: 64, 32>}, {pipeline_mode = #tpu.pipeline_mode<synchronous>, transform_indices = @transform_3, window_bounds = array<i64: 1, 32>}, {pipeline_mode = #tpu.pipeline_mode<synchronous>, transform_indices = @transform_4, window_bounds = array<i64: 32, 128>}, {pipeline_mode = #tpu.pipeline_mode<synchronous>, transform_indices = @transform_5, window_bounds = array<i64: 16, 128>}, {pipeline_mode = #tpu.pipeline_mode<synchronous>, transform_indices = @transform_6, window_bounds = array<i64: 1, 128>}, {pipeline_mode = #tpu.pipeline_mode<synchronous>, transform_indices = @transform_7, window_bounds = array<i64: 16, 128>}, {pipeline_mode = #tpu.pipeline_mode<synchronous>, transform_indices = @transform_8, window_bounds = array<i64: 16, 128>}, {pipeline_mode = #tpu.pipeline_mode<synchronous>, transform_indices = @transform_9, window_bounds = array<i64: 1, 128>}, {pipeline_mode = #tpu.pipeline_mode<synchronous>, transform_indices = @transform_10, window_bounds = array<i64: 1, 128>}, {transform_indices = @transform_11, window_bounds = array<i64: 1, 8, 1>}, {transform_indices = @transform_12, window_bounds = array<i64: 1, 8, 1>}, {transform_indices = @transform_13, window_bounds = array<i64: 1, 8, 128>}, {transform_indices = @transform_14, window_bounds = array<i64: 1, 1, 1>}, {transform_indices = @transform_15, window_bounds = array<i64: 1, 1, 1>}]} {
    %c0 = arith.constant 0 : index
    %c0_0 = arith.constant 0 : index
    %c0_1 = arith.constant 0 : index
    %0 = vector.load %arg1[%c0, %c0_0, %c0_1] : memref<1x8x64xbf16, #tpu.memory_space<vmem>>, vector<1x8x64xbf16>
    %1 = vector.shape_cast %0 : vector<1x8x64xbf16> to vector<8x64xbf16>
    %c0_2 = arith.constant 0 : index
    %c0_3 = arith.constant 0 : index
    %c0_4 = arith.constant 0 : index
    %2 = vector.load %arg2[%c0_2, %c0_3, %c0_4] : memref<1x8x32xbf16, #tpu.memory_space<vmem>>, vector<1x8x32xbf16>
    %3 = vector.shape_cast %2 : vector<1x8x32xbf16> to vector<8x32xbf16>
    %c0_5 = arith.constant 0 : index
    %c0_6 = arith.constant 0 : index
    %4 = vector.load %arg3[%c0_5, %c0_6] : memref<64x32xbf16, #tpu.memory_space<vmem>>, vector<64x32xbf16>
    %c0_7 = arith.constant 0 : index
    %c0_8 = arith.constant 0 : index
    %5 = vector.load %arg4[%c0_7, %c0_8] : memref<1x32xf32, #tpu.memory_space<vmem>>, vector<1x32xf32>
    %cst = arith.constant dense<0.000000e+00> : vector<8x32xf32>
    %6 = tpu.matmul %1, %4, %cst {dimension_numbers = #tpu.dot_dimension_numbers<[1], [0], [0], [1], [0, 0, 1, 1], [], []>} : vector<8x64xbf16>, vector<64x32xbf16>, vector<8x32xf32> -> vector<8x32xf32>
    %7 = vector.broadcast %5 : vector<1x32xf32> to vector<8x32xf32>
    %8 = arith.addf %6, %7 : vector<8x32xf32>
    %9 = arith.truncf %8 : vector<8x32xf32> to vector<8x32xbf16>
    %10 = tpu.concatenate %9, %3 in 1 : vector<8x32xbf16>, vector<8x32xbf16> -> vector<8x64xbf16>
    %cst_9 = arith.constant dense<0.000000e+00> : vector<8x32xf32>
    %11 = tpu.matmul %10, %4, %cst_9 {dimension_numbers = #tpu.dot_dimension_numbers<[1], [0], [0], [1], [0, 0, 1, 1], [], []>} : vector<8x64xbf16>, vector<64x32xbf16>, vector<8x32xf32> -> vector<8x32xf32>
    %12 = vector.broadcast %5 : vector<1x32xf32> to vector<8x32xf32>
    %13 = arith.addf %11, %12 : vector<8x32xf32>
    %14 = arith.truncf %13 : vector<8x32xf32> to vector<8x32xbf16>
    %c0_10 = arith.constant 0 : index
    %c0_11 = arith.constant 0 : index
    %15 = vector.load %arg5[%c0_10, %c0_11] : memref<32x128xbf16, #tpu.memory_space<vmem>>, vector<32x128xbf16>
    %cst_12 = arith.constant dense<0.000000e+00> : vector<8x128xf32>
    %16 = tpu.matmul %14, %15, %cst_12 {dimension_numbers = #tpu.dot_dimension_numbers<[1], [0], [0], [1], [0, 0, 1, 1], [], []>} : vector<8x32xbf16>, vector<32x128xbf16>, vector<8x128xf32> -> vector<8x128xf32>
    %c0_13 = arith.constant 0 : index
    %c0_14 = arith.constant 0 : index
    %17 = vector.load %arg7[%c0_13, %c0_14] : memref<1x128xf32, #tpu.memory_space<vmem>>, vector<1x128xf32>
    %18 = vector.broadcast %17 : vector<1x128xf32> to vector<8x128xf32>
    %19 = arith.addf %16, %18 : vector<8x128xf32>
    %c0_15 = arith.constant 0 : index
    %c0_16 = arith.constant 0 : index
    %20 = vector.load %arg6[%c0_15, %c0_16] : memref<16x128xf32, #tpu.memory_space<vmem>>, vector<16x128xf32>
    %cst_17 = arith.constant 0.000000e+00 : f32
    %21 = vector.broadcast %cst_17 : f32 to vector<2x16xf32>
    %cst_18 = arith.constant 0.000000e+00 : f32
    %22 = vector.broadcast %cst_18 : f32 to vector<2x16xf32>
    %23 = vector.extract_strided_slice %19 {offsets = [0, 0], sizes = [1, 64], strides = [1, 1]} : vector<8x128xf32> to vector<1x64xf32>
    %24 = vector.extract_strided_slice %19 {offsets = [7, 64], sizes = [1, 64], strides = [1, 1]} : vector<8x128xf32> to vector<1x64xf32>
    %cst_19 = arith.constant dense<0.000000e+00> : vector<2x128xf32>
    %25 = tpu.matmul %21, %20, %cst_19 {dimension_numbers = #tpu.dot_dimension_numbers<[1], [0], [0], [1], [0, 0, 1, 1], [], []>} : vector<2x16xf32>, vector<16x128xf32>, vector<2x128xf32> -> vector<2x128xf32>
    %26 = tpu.concatenate %23, %24 in 0 : vector<1x64xf32>, vector<1x64xf32> -> vector<2x64xf32>
    %27 = vector.extract_strided_slice %25 {offsets = [0, 0], sizes = [1, 64], strides = [1, 1]} : vector<2x128xf32> to vector<1x64xf32>
    %28 = vector.extract_strided_slice %25 {offsets = [1, 64], sizes = [1, 64], strides = [1, 1]} : vector<2x128xf32> to vector<1x64xf32>
    %29 = tpu.concatenate %27, %28 in 0 : vector<1x64xf32>, vector<1x64xf32> -> vector<2x64xf32>
    %30 = arith.addf %26, %29 : vector<2x64xf32>
    %31 = vector.extract_strided_slice %30 {offsets = [0, 0], sizes = [2, 48], strides = [1, 1]} : vector<2x64xf32> to vector<2x48xf32>
    %32 = arith.negf %31 : vector<2x48xf32>
    %33 = math.exp %32 : vector<2x48xf32>
    %cst_20 = arith.constant 1.000000e+00 : f32
    %34 = vector.broadcast %cst_20 : f32 to vector<2x48xf32>
    %35 = arith.addf %34, %33 : vector<2x48xf32>
    %36 = arith.divf %34, %35 : vector<2x48xf32>
    %37 = vector.extract_strided_slice %30 {offsets = [0, 48], sizes = [2, 16], strides = [1, 1]} : vector<2x64xf32> to vector<2x16xf32>
    %38 = math.tanh %37 : vector<2x16xf32>
    %39 = vector.extract_strided_slice %36 {offsets = [0, 0], sizes = [2, 16], strides = [1, 1]} : vector<2x48xf32> to vector<2x16xf32>
    %40 = vector.extract_strided_slice %36 {offsets = [0, 16], sizes = [2, 16], strides = [1, 1]} : vector<2x48xf32> to vector<2x16xf32>
    %41 = vector.extract_strided_slice %36 {offsets = [0, 32], sizes = [2, 16], strides = [1, 1]} : vector<2x48xf32> to vector<2x16xf32>
    %42 = arith.mulf %40, %22 : vector<2x16xf32>
    %43 = arith.mulf %39, %38 : vector<2x16xf32>
    %44 = arith.addf %42, %43 : vector<2x16xf32>
    %45 = math.tanh %44 : vector<2x16xf32>
    %46 = arith.mulf %41, %45 : vector<2x16xf32>
    %47 = vector.extract_strided_slice %46 {offsets = [0, 0], sizes = [1, 16], strides = [1, 1]} : vector<2x16xf32> to vector<1x16xf32>
    %48 = vector.extract_strided_slice %46 {offsets = [1, 0], sizes = [1, 16], strides = [1, 1]} : vector<2x16xf32> to vector<1x16xf32>
    %49 = vector.extract_strided_slice %19 {offsets = [1, 0], sizes = [1, 64], strides = [1, 1]} : vector<8x128xf32> to vector<1x64xf32>
    %50 = vector.extract_strided_slice %19 {offsets = [6, 64], sizes = [1, 64], strides = [1, 1]} : vector<8x128xf32> to vector<1x64xf32>
    %cst_21 = arith.constant dense<0.000000e+00> : vector<2x128xf32>
    %51 = tpu.matmul %46, %20, %cst_21 {dimension_numbers = #tpu.dot_dimension_numbers<[1], [0], [0], [1], [0, 0, 1, 1], [], []>} : vector<2x16xf32>, vector<16x128xf32>, vector<2x128xf32> -> vector<2x128xf32>
    %52 = tpu.concatenate %49, %50 in 0 : vector<1x64xf32>, vector<1x64xf32> -> vector<2x64xf32>
    %53 = vector.extract_strided_slice %51 {offsets = [0, 0], sizes = [1, 64], strides = [1, 1]} : vector<2x128xf32> to vector<1x64xf32>
    %54 = vector.extract_strided_slice %51 {offsets = [1, 64], sizes = [1, 64], strides = [1, 1]} : vector<2x128xf32> to vector<1x64xf32>
    %55 = tpu.concatenate %53, %54 in 0 : vector<1x64xf32>, vector<1x64xf32> -> vector<2x64xf32>
    %56 = arith.addf %52, %55 : vector<2x64xf32>
    %57 = vector.extract_strided_slice %56 {offsets = [0, 0], sizes = [2, 48], strides = [1, 1]} : vector<2x64xf32> to vector<2x48xf32>
    %58 = arith.negf %57 : vector<2x48xf32>
    %59 = math.exp %58 : vector<2x48xf32>
    %cst_22 = arith.constant 1.000000e+00 : f32
    %60 = vector.broadcast %cst_22 : f32 to vector<2x48xf32>
    %61 = arith.addf %60, %59 : vector<2x48xf32>
    %62 = arith.divf %60, %61 : vector<2x48xf32>
    %63 = vector.extract_strided_slice %56 {offsets = [0, 48], sizes = [2, 16], strides = [1, 1]} : vector<2x64xf32> to vector<2x16xf32>
    %64 = math.tanh %63 : vector<2x16xf32>
    %65 = vector.extract_strided_slice %62 {offsets = [0, 0], sizes = [2, 16], strides = [1, 1]} : vector<2x48xf32> to vector<2x16xf32>
    %66 = vector.extract_strided_slice %62 {offsets = [0, 16], sizes = [2, 16], strides = [1, 1]} : vector<2x48xf32> to vector<2x16xf32>
    %67 = vector.extract_strided_slice %62 {offsets = [0, 32], sizes = [2, 16], strides = [1, 1]} : vector<2x48xf32> to vector<2x16xf32>
    %68 = arith.mulf %66, %44 : vector<2x16xf32>
    %69 = arith.mulf %65, %64 : vector<2x16xf32>
    %70 = arith.addf %68, %69 : vector<2x16xf32>
    %71 = math.tanh %70 : vector<2x16xf32>
    %72 = arith.mulf %67, %71 : vector<2x16xf32>
    %73 = vector.extract_strided_slice %72 {offsets = [0, 0], sizes = [1, 16], strides = [1, 1]} : vector<2x16xf32> to vector<1x16xf32>
    %74 = vector.extract_strided_slice %72 {offsets = [1, 0], sizes = [1, 16], strides = [1, 1]} : vector<2x16xf32> to vector<1x16xf32>
    %75 = vector.extract_strided_slice %19 {offsets = [2, 0], sizes = [1, 64], strides = [1, 1]} : vector<8x128xf32> to vector<1x64xf32>
    %76 = vector.extract_strided_slice %19 {offsets = [5, 64], sizes = [1, 64], strides = [1, 1]} : vector<8x128xf32> to vector<1x64xf32>
    %cst_23 = arith.constant dense<0.000000e+00> : vector<2x128xf32>
    %77 = tpu.matmul %72, %20, %cst_23 {dimension_numbers = #tpu.dot_dimension_numbers<[1], [0], [0], [1], [0, 0, 1, 1], [], []>} : vector<2x16xf32>, vector<16x128xf32>, vector<2x128xf32> -> vector<2x128xf32>
    %78 = tpu.concatenate %75, %76 in 0 : vector<1x64xf32>, vector<1x64xf32> -> vector<2x64xf32>
    %79 = vector.extract_strided_slice %77 {offsets = [0, 0], sizes = [1, 64], strides = [1, 1]} : vector<2x128xf32> to vector<1x64xf32>
    %80 = vector.extract_strided_slice %77 {offsets = [1, 64], sizes = [1, 64], strides = [1, 1]} : vector<2x128xf32> to vector<1x64xf32>
    %81 = tpu.concatenate %79, %80 in 0 : vector<1x64xf32>, vector<1x64xf32> -> vector<2x64xf32>
    %82 = arith.addf %78, %81 : vector<2x64xf32>
    %83 = vector.extract_strided_slice %82 {offsets = [0, 0], sizes = [2, 48], strides = [1, 1]} : vector<2x64xf32> to vector<2x48xf32>
    %84 = arith.negf %83 : vector<2x48xf32>
    %85 = math.exp %84 : vector<2x48xf32>
    %cst_24 = arith.constant 1.000000e+00 : f32
    %86 = vector.broadcast %cst_24 : f32 to vector<2x48xf32>
    %87 = arith.addf %86, %85 : vector<2x48xf32>
    %88 = arith.divf %86, %87 : vector<2x48xf32>
    %89 = vector.extract_strided_slice %82 {offsets = [0, 48], sizes = [2, 16], strides = [1, 1]} : vector<2x64xf32> to vector<2x16xf32>
    %90 = math.tanh %89 : vector<2x16xf32>
    %91 = vector.extract_strided_slice %88 {offsets = [0, 0], sizes = [2, 16], strides = [1, 1]} : vector<2x48xf32> to vector<2x16xf32>
    %92 = vector.extract_strided_slice %88 {offsets = [0, 16], sizes = [2, 16], strides = [1, 1]} : vector<2x48xf32> to vector<2x16xf32>
    %93 = vector.extract_strided_slice %88 {offsets = [0, 32], sizes = [2, 16], strides = [1, 1]} : vector<2x48xf32> to vector<2x16xf32>
    %94 = arith.mulf %92, %70 : vector<2x16xf32>
    %95 = arith.mulf %91, %90 : vector<2x16xf32>
    %96 = arith.addf %94, %95 : vector<2x16xf32>
    %97 = math.tanh %96 : vector<2x16xf32>
    %98 = arith.mulf %93, %97 : vector<2x16xf32>
    %99 = vector.extract_strided_slice %98 {offsets = [0, 0], sizes = [1, 16], strides = [1, 1]} : vector<2x16xf32> to vector<1x16xf32>
    %100 = vector.extract_strided_slice %98 {offsets = [1, 0], sizes = [1, 16], strides = [1, 1]} : vector<2x16xf32> to vector<1x16xf32>
    %101 = vector.extract_strided_slice %19 {offsets = [3, 0], sizes = [1, 64], strides = [1, 1]} : vector<8x128xf32> to vector<1x64xf32>
    %102 = vector.extract_strided_slice %19 {offsets = [4, 64], sizes = [1, 64], strides = [1, 1]} : vector<8x128xf32> to vector<1x64xf32>
    %cst_25 = arith.constant dense<0.000000e+00> : vector<2x128xf32>
    %103 = tpu.matmul %98, %20, %cst_25 {dimension_numbers = #tpu.dot_dimension_numbers<[1], [0], [0], [1], [0, 0, 1, 1], [], []>} : vector<2x16xf32>, vector<16x128xf32>, vector<2x128xf32> -> vector<2x128xf32>
    %104 = tpu.concatenate %101, %102 in 0 : vector<1x64xf32>, vector<1x64xf32> -> vector<2x64xf32>
    %105 = vector.extract_strided_slice %103 {offsets = [0, 0], sizes = [1, 64], strides = [1, 1]} : vector<2x128xf32> to vector<1x64xf32>
    %106 = vector.extract_strided_slice %103 {offsets = [1, 64], sizes = [1, 64], strides = [1, 1]} : vector<2x128xf32> to vector<1x64xf32>
    %107 = tpu.concatenate %105, %106 in 0 : vector<1x64xf32>, vector<1x64xf32> -> vector<2x64xf32>
    %108 = arith.addf %104, %107 : vector<2x64xf32>
    %109 = vector.extract_strided_slice %108 {offsets = [0, 0], sizes = [2, 48], strides = [1, 1]} : vector<2x64xf32> to vector<2x48xf32>
    %110 = arith.negf %109 : vector<2x48xf32>
    %111 = math.exp %110 : vector<2x48xf32>
    %cst_26 = arith.constant 1.000000e+00 : f32
    %112 = vector.broadcast %cst_26 : f32 to vector<2x48xf32>
    %113 = arith.addf %112, %111 : vector<2x48xf32>
    %114 = arith.divf %112, %113 : vector<2x48xf32>
    %115 = vector.extract_strided_slice %108 {offsets = [0, 48], sizes = [2, 16], strides = [1, 1]} : vector<2x64xf32> to vector<2x16xf32>
    %116 = math.tanh %115 : vector<2x16xf32>
    %117 = vector.extract_strided_slice %114 {offsets = [0, 0], sizes = [2, 16], strides = [1, 1]} : vector<2x48xf32> to vector<2x16xf32>
    %118 = vector.extract_strided_slice %114 {offsets = [0, 16], sizes = [2, 16], strides = [1, 1]} : vector<2x48xf32> to vector<2x16xf32>
    %119 = vector.extract_strided_slice %114 {offsets = [0, 32], sizes = [2, 16], strides = [1, 1]} : vector<2x48xf32> to vector<2x16xf32>
    %120 = arith.mulf %118, %96 : vector<2x16xf32>
    %121 = arith.mulf %117, %116 : vector<2x16xf32>
    %122 = arith.addf %120, %121 : vector<2x16xf32>
    %123 = math.tanh %122 : vector<2x16xf32>
    %124 = arith.mulf %119, %123 : vector<2x16xf32>
    %125 = vector.extract_strided_slice %124 {offsets = [0, 0], sizes = [1, 16], strides = [1, 1]} : vector<2x16xf32> to vector<1x16xf32>
    %126 = vector.extract_strided_slice %124 {offsets = [1, 0], sizes = [1, 16], strides = [1, 1]} : vector<2x16xf32> to vector<1x16xf32>
    %127 = vector.extract_strided_slice %19 {offsets = [4, 0], sizes = [1, 64], strides = [1, 1]} : vector<8x128xf32> to vector<1x64xf32>
    %128 = vector.extract_strided_slice %19 {offsets = [3, 64], sizes = [1, 64], strides = [1, 1]} : vector<8x128xf32> to vector<1x64xf32>
    %cst_27 = arith.constant dense<0.000000e+00> : vector<2x128xf32>
    %129 = tpu.matmul %124, %20, %cst_27 {dimension_numbers = #tpu.dot_dimension_numbers<[1], [0], [0], [1], [0, 0, 1, 1], [], []>} : vector<2x16xf32>, vector<16x128xf32>, vector<2x128xf32> -> vector<2x128xf32>
    %130 = tpu.concatenate %127, %128 in 0 : vector<1x64xf32>, vector<1x64xf32> -> vector<2x64xf32>
    %131 = vector.extract_strided_slice %129 {offsets = [0, 0], sizes = [1, 64], strides = [1, 1]} : vector<2x128xf32> to vector<1x64xf32>
    %132 = vector.extract_strided_slice %129 {offsets = [1, 64], sizes = [1, 64], strides = [1, 1]} : vector<2x128xf32> to vector<1x64xf32>
    %133 = tpu.concatenate %131, %132 in 0 : vector<1x64xf32>, vector<1x64xf32> -> vector<2x64xf32>
    %134 = arith.addf %130, %133 : vector<2x64xf32>
    %135 = vector.extract_strided_slice %134 {offsets = [0, 0], sizes = [2, 48], strides = [1, 1]} : vector<2x64xf32> to vector<2x48xf32>
    %136 = arith.negf %135 : vector<2x48xf32>
    %137 = math.exp %136 : vector<2x48xf32>
    %cst_28 = arith.constant 1.000000e+00 : f32
    %138 = vector.broadcast %cst_28 : f32 to vector<2x48xf32>
    %139 = arith.addf %138, %137 : vector<2x48xf32>
    %140 = arith.divf %138, %139 : vector<2x48xf32>
    %141 = vector.extract_strided_slice %134 {offsets = [0, 48], sizes = [2, 16], strides = [1, 1]} : vector<2x64xf32> to vector<2x16xf32>
    %142 = math.tanh %141 : vector<2x16xf32>
    %143 = vector.extract_strided_slice %140 {offsets = [0, 0], sizes = [2, 16], strides = [1, 1]} : vector<2x48xf32> to vector<2x16xf32>
    %144 = vector.extract_strided_slice %140 {offsets = [0, 16], sizes = [2, 16], strides = [1, 1]} : vector<2x48xf32> to vector<2x16xf32>
    %145 = vector.extract_strided_slice %140 {offsets = [0, 32], sizes = [2, 16], strides = [1, 1]} : vector<2x48xf32> to vector<2x16xf32>
    %146 = arith.mulf %144, %122 : vector<2x16xf32>
    %147 = arith.mulf %143, %142 : vector<2x16xf32>
    %148 = arith.addf %146, %147 : vector<2x16xf32>
    %149 = math.tanh %148 : vector<2x16xf32>
    %150 = arith.mulf %145, %149 : vector<2x16xf32>
    %151 = vector.extract_strided_slice %150 {offsets = [0, 0], sizes = [1, 16], strides = [1, 1]} : vector<2x16xf32> to vector<1x16xf32>
    %152 = vector.extract_strided_slice %150 {offsets = [1, 0], sizes = [1, 16], strides = [1, 1]} : vector<2x16xf32> to vector<1x16xf32>
    %153 = vector.extract_strided_slice %19 {offsets = [5, 0], sizes = [1, 64], strides = [1, 1]} : vector<8x128xf32> to vector<1x64xf32>
    %154 = vector.extract_strided_slice %19 {offsets = [2, 64], sizes = [1, 64], strides = [1, 1]} : vector<8x128xf32> to vector<1x64xf32>
    %cst_29 = arith.constant dense<0.000000e+00> : vector<2x128xf32>
    %155 = tpu.matmul %150, %20, %cst_29 {dimension_numbers = #tpu.dot_dimension_numbers<[1], [0], [0], [1], [0, 0, 1, 1], [], []>} : vector<2x16xf32>, vector<16x128xf32>, vector<2x128xf32> -> vector<2x128xf32>
    %156 = tpu.concatenate %153, %154 in 0 : vector<1x64xf32>, vector<1x64xf32> -> vector<2x64xf32>
    %157 = vector.extract_strided_slice %155 {offsets = [0, 0], sizes = [1, 64], strides = [1, 1]} : vector<2x128xf32> to vector<1x64xf32>
    %158 = vector.extract_strided_slice %155 {offsets = [1, 64], sizes = [1, 64], strides = [1, 1]} : vector<2x128xf32> to vector<1x64xf32>
    %159 = tpu.concatenate %157, %158 in 0 : vector<1x64xf32>, vector<1x64xf32> -> vector<2x64xf32>
    %160 = arith.addf %156, %159 : vector<2x64xf32>
    %161 = vector.extract_strided_slice %160 {offsets = [0, 0], sizes = [2, 48], strides = [1, 1]} : vector<2x64xf32> to vector<2x48xf32>
    %162 = arith.negf %161 : vector<2x48xf32>
    %163 = math.exp %162 : vector<2x48xf32>
    %cst_30 = arith.constant 1.000000e+00 : f32
    %164 = vector.broadcast %cst_30 : f32 to vector<2x48xf32>
    %165 = arith.addf %164, %163 : vector<2x48xf32>
    %166 = arith.divf %164, %165 : vector<2x48xf32>
    %167 = vector.extract_strided_slice %160 {offsets = [0, 48], sizes = [2, 16], strides = [1, 1]} : vector<2x64xf32> to vector<2x16xf32>
    %168 = math.tanh %167 : vector<2x16xf32>
    %169 = vector.extract_strided_slice %166 {offsets = [0, 0], sizes = [2, 16], strides = [1, 1]} : vector<2x48xf32> to vector<2x16xf32>
    %170 = vector.extract_strided_slice %166 {offsets = [0, 16], sizes = [2, 16], strides = [1, 1]} : vector<2x48xf32> to vector<2x16xf32>
    %171 = vector.extract_strided_slice %166 {offsets = [0, 32], sizes = [2, 16], strides = [1, 1]} : vector<2x48xf32> to vector<2x16xf32>
    %172 = arith.mulf %170, %148 : vector<2x16xf32>
    %173 = arith.mulf %169, %168 : vector<2x16xf32>
    %174 = arith.addf %172, %173 : vector<2x16xf32>
    %175 = math.tanh %174 : vector<2x16xf32>
    %176 = arith.mulf %171, %175 : vector<2x16xf32>
    %177 = vector.extract_strided_slice %176 {offsets = [0, 0], sizes = [1, 16], strides = [1, 1]} : vector<2x16xf32> to vector<1x16xf32>
    %178 = vector.extract_strided_slice %176 {offsets = [1, 0], sizes = [1, 16], strides = [1, 1]} : vector<2x16xf32> to vector<1x16xf32>
    %179 = vector.extract_strided_slice %19 {offsets = [6, 0], sizes = [1, 64], strides = [1, 1]} : vector<8x128xf32> to vector<1x64xf32>
    %180 = vector.extract_strided_slice %19 {offsets = [1, 64], sizes = [1, 64], strides = [1, 1]} : vector<8x128xf32> to vector<1x64xf32>
    %cst_31 = arith.constant dense<0.000000e+00> : vector<2x128xf32>
    %181 = tpu.matmul %176, %20, %cst_31 {dimension_numbers = #tpu.dot_dimension_numbers<[1], [0], [0], [1], [0, 0, 1, 1], [], []>} : vector<2x16xf32>, vector<16x128xf32>, vector<2x128xf32> -> vector<2x128xf32>
    %182 = tpu.concatenate %179, %180 in 0 : vector<1x64xf32>, vector<1x64xf32> -> vector<2x64xf32>
    %183 = vector.extract_strided_slice %181 {offsets = [0, 0], sizes = [1, 64], strides = [1, 1]} : vector<2x128xf32> to vector<1x64xf32>
    %184 = vector.extract_strided_slice %181 {offsets = [1, 64], sizes = [1, 64], strides = [1, 1]} : vector<2x128xf32> to vector<1x64xf32>
    %185 = tpu.concatenate %183, %184 in 0 : vector<1x64xf32>, vector<1x64xf32> -> vector<2x64xf32>
    %186 = arith.addf %182, %185 : vector<2x64xf32>
    %187 = vector.extract_strided_slice %186 {offsets = [0, 0], sizes = [2, 48], strides = [1, 1]} : vector<2x64xf32> to vector<2x48xf32>
    %188 = arith.negf %187 : vector<2x48xf32>
    %189 = math.exp %188 : vector<2x48xf32>
    %cst_32 = arith.constant 1.000000e+00 : f32
    %190 = vector.broadcast %cst_32 : f32 to vector<2x48xf32>
    %191 = arith.addf %190, %189 : vector<2x48xf32>
    %192 = arith.divf %190, %191 : vector<2x48xf32>
    %193 = vector.extract_strided_slice %186 {offsets = [0, 48], sizes = [2, 16], strides = [1, 1]} : vector<2x64xf32> to vector<2x16xf32>
    %194 = math.tanh %193 : vector<2x16xf32>
    %195 = vector.extract_strided_slice %192 {offsets = [0, 0], sizes = [2, 16], strides = [1, 1]} : vector<2x48xf32> to vector<2x16xf32>
    %196 = vector.extract_strided_slice %192 {offsets = [0, 16], sizes = [2, 16], strides = [1, 1]} : vector<2x48xf32> to vector<2x16xf32>
    %197 = vector.extract_strided_slice %192 {offsets = [0, 32], sizes = [2, 16], strides = [1, 1]} : vector<2x48xf32> to vector<2x16xf32>
    %198 = arith.mulf %196, %174 : vector<2x16xf32>
    %199 = arith.mulf %195, %194 : vector<2x16xf32>
    %200 = arith.addf %198, %199 : vector<2x16xf32>
    %201 = math.tanh %200 : vector<2x16xf32>
    %202 = arith.mulf %197, %201 : vector<2x16xf32>
    %203 = vector.extract_strided_slice %202 {offsets = [0, 0], sizes = [1, 16], strides = [1, 1]} : vector<2x16xf32> to vector<1x16xf32>
    %204 = vector.extract_strided_slice %202 {offsets = [1, 0], sizes = [1, 16], strides = [1, 1]} : vector<2x16xf32> to vector<1x16xf32>
    %205 = vector.extract_strided_slice %19 {offsets = [7, 0], sizes = [1, 64], strides = [1, 1]} : vector<8x128xf32> to vector<1x64xf32>
    %206 = vector.extract_strided_slice %19 {offsets = [0, 64], sizes = [1, 64], strides = [1, 1]} : vector<8x128xf32> to vector<1x64xf32>
    %cst_33 = arith.constant dense<0.000000e+00> : vector<2x128xf32>
    %207 = tpu.matmul %202, %20, %cst_33 {dimension_numbers = #tpu.dot_dimension_numbers<[1], [0], [0], [1], [0, 0, 1, 1], [], []>} : vector<2x16xf32>, vector<16x128xf32>, vector<2x128xf32> -> vector<2x128xf32>
    %208 = tpu.concatenate %205, %206 in 0 : vector<1x64xf32>, vector<1x64xf32> -> vector<2x64xf32>
    %209 = vector.extract_strided_slice %207 {offsets = [0, 0], sizes = [1, 64], strides = [1, 1]} : vector<2x128xf32> to vector<1x64xf32>
    %210 = vector.extract_strided_slice %207 {offsets = [1, 64], sizes = [1, 64], strides = [1, 1]} : vector<2x128xf32> to vector<1x64xf32>
    %211 = tpu.concatenate %209, %210 in 0 : vector<1x64xf32>, vector<1x64xf32> -> vector<2x64xf32>
    %212 = arith.addf %208, %211 : vector<2x64xf32>
    %213 = vector.extract_strided_slice %212 {offsets = [0, 0], sizes = [2, 48], strides = [1, 1]} : vector<2x64xf32> to vector<2x48xf32>
    %214 = arith.negf %213 : vector<2x48xf32>
    %215 = math.exp %214 : vector<2x48xf32>
    %cst_34 = arith.constant 1.000000e+00 : f32
    %216 = vector.broadcast %cst_34 : f32 to vector<2x48xf32>
    %217 = arith.addf %216, %215 : vector<2x48xf32>
    %218 = arith.divf %216, %217 : vector<2x48xf32>
    %219 = vector.extract_strided_slice %212 {offsets = [0, 48], sizes = [2, 16], strides = [1, 1]} : vector<2x64xf32> to vector<2x16xf32>
    %220 = math.tanh %219 : vector<2x16xf32>
    %221 = vector.extract_strided_slice %218 {offsets = [0, 0], sizes = [2, 16], strides = [1, 1]} : vector<2x48xf32> to vector<2x16xf32>
    %222 = vector.extract_strided_slice %218 {offsets = [0, 16], sizes = [2, 16], strides = [1, 1]} : vector<2x48xf32> to vector<2x16xf32>
    %223 = vector.extract_strided_slice %218 {offsets = [0, 32], sizes = [2, 16], strides = [1, 1]} : vector<2x48xf32> to vector<2x16xf32>
    %224 = arith.mulf %222, %200 : vector<2x16xf32>
    %225 = arith.mulf %221, %220 : vector<2x16xf32>
    %226 = arith.addf %224, %225 : vector<2x16xf32>
    %227 = math.tanh %226 : vector<2x16xf32>
    %228 = arith.mulf %223, %227 : vector<2x16xf32>
    %229 = vector.extract_strided_slice %228 {offsets = [0, 0], sizes = [1, 16], strides = [1, 1]} : vector<2x16xf32> to vector<1x16xf32>
    %230 = vector.extract_strided_slice %228 {offsets = [1, 0], sizes = [1, 16], strides = [1, 1]} : vector<2x16xf32> to vector<1x16xf32>
    %231 = tpu.concatenate %47, %73, %99, %125, %151, %177, %203, %229 in 0 : vector<1x16xf32>, vector<1x16xf32>, vector<1x16xf32>, vector<1x16xf32>, vector<1x16xf32>, vector<1x16xf32>, vector<1x16xf32>, vector<1x16xf32> -> vector<8x16xf32>
    %232 = tpu.concatenate %230, %204, %178, %152, %126, %100, %74, %48 in 0 : vector<1x16xf32>, vector<1x16xf32>, vector<1x16xf32>, vector<1x16xf32>, vector<1x16xf32>, vector<1x16xf32>, vector<1x16xf32>, vector<1x16xf32> -> vector<8x16xf32>
    %233 = arith.truncf %231 : vector<8x16xf32> to vector<8x16xbf16>
    %c0_35 = arith.constant 0 : index
    %c0_36 = arith.constant 0 : index
    %234 = vector.load %arg8[%c0_35, %c0_36] : memref<16x128xbf16, #tpu.memory_space<vmem>>, vector<16x128xbf16>
    %cst_37 = arith.constant dense<0.000000e+00> : vector<8x128xf32>
    %235 = tpu.matmul %233, %234, %cst_37 {dimension_numbers = #tpu.dot_dimension_numbers<[1], [0], [0], [1], [0, 0, 1, 1], [], []>} : vector<8x16xbf16>, vector<16x128xbf16>, vector<8x128xf32> -> vector<8x128xf32>
    %236 = arith.truncf %232 : vector<8x16xf32> to vector<8x16xbf16>
    %c0_38 = arith.constant 0 : index
    %c0_39 = arith.constant 0 : index
    %237 = vector.load %arg9[%c0_38, %c0_39] : memref<16x128xbf16, #tpu.memory_space<vmem>>, vector<16x128xbf16>
    %cst_40 = arith.constant dense<0.000000e+00> : vector<8x128xf32>
    %238 = tpu.matmul %236, %237, %cst_40 {dimension_numbers = #tpu.dot_dimension_numbers<[1], [0], [0], [1], [0, 0, 1, 1], [], []>} : vector<8x16xbf16>, vector<16x128xbf16>, vector<8x128xf32> -> vector<8x128xf32>
    %239 = arith.addf %235, %238 : vector<8x128xf32>
    %c0_41 = arith.constant 0 : index
    %c0_42 = arith.constant 0 : index
    %240 = vector.load %arg10[%c0_41, %c0_42] : memref<1x128xf32, #tpu.memory_space<vmem>>, vector<1x128xf32>
    %241 = vector.broadcast %240 : vector<1x128xf32> to vector<8x128xf32>
    %242 = arith.addf %239, %241 : vector<8x128xf32>
    %243 = vector.shape_cast %242 : vector<8x128xf32> to vector<1x8x128xf32>
    %c0_43 = arith.constant 0 : index
    %c0_44 = arith.constant 0 : index
    %c0_45 = arith.constant 0 : index
    %244 = vector.load %arg14[%c0_43, %c0_44, %c0_45] : memref<1x8x128xf32, #tpu.memory_space<vmem>>, vector<1x8x128xf32>
    tpu.vector_store %arg14[%c0_43, %c0_44, %c0_45], %243 {strides = array<i32>} : memref<1x8x128xf32, #tpu.memory_space<vmem>>, vector<1x8x128xf32>,
    %245 = vector.shape_cast %243 : vector<1x8x128xf32> to vector<8x128xf32>
    %246 = tpu.iota {dimensions = array<i32: 1>} : vector<8x128xi32>
    %c5_i32 = arith.constant 5 : i32
    %247 = vector.broadcast %c5_i32 : i32 to vector<8x128xi32>
    %248 = arith.cmpi slt, %246, %247 : vector<8x128xi32>
    %cst_46 = arith.constant 0xFF800000 : f32
    %249 = vector.broadcast %cst_46 : f32 to vector<8x128xf32>
    %250 = arith.select %248, %245, %249 : vector<8x128xi1>, vector<8x128xf32>
    %cst_47 = arith.constant dense<0xFF800000> : vector<8xf32>
    %251 = vector.multi_reduction <maximumf>, %250, %cst_47 [1] : vector<8x128xf32> to vector<8xf32>
    %252 = vector.shape_cast %251 : vector<8xf32> to vector<8x1xf32>
    %253 = vector.broadcast %252 : vector<8x1xf32> to vector<8x128xf32>
    %254 = arith.subf %245, %253 : vector<8x128xf32>
    %255 = math.exp %254 : vector<8x128xf32>
    %cst_48 = arith.constant 0.000000e+00 : f32
    %256 = vector.broadcast %cst_48 : f32 to vector<8x128xf32>
    %257 = arith.select %248, %255, %256 : vector<8x128xi1>, vector<8x128xf32>
    %258 = vector.broadcast %252 : vector<8x1xf32> to vector<8x128xf32>
    %259 = arith.subf %245, %258 : vector<8x128xf32>
    %cst_49 = arith.constant dense<0.000000e+00> : vector<8xf32>
    %260 = vector.multi_reduction <add>, %257, %cst_49 [1] : vector<8x128xf32> to vector<8xf32>
    %261 = vector.shape_cast %260 : vector<8xf32> to vector<8x1xf32>
    %262 = math.log %261 : vector<8x1xf32>
    %263 = vector.broadcast %262 : vector<8x1xf32> to vector<8x128xf32>
    %264 = arith.subf %259, %263 : vector<8x128xf32>
    %c0_50 = arith.constant 0 : index
    %c0_51 = arith.constant 0 : index
    %c0_52 = arith.constant 0 : index
    %265 = vector.load %arg13[%c0_50, %c0_51, %c0_52] : memref<1x8x1xi32, #tpu.memory_space<vmem>>, vector<1x8x1xi32>
    %266 = vector.shape_cast %265 : vector<1x8x1xi32> to vector<8x1xi32>
    %267 = vector.broadcast %266 : vector<8x1xi32> to vector<8x128xi32>
    %268 = arith.cmpi eq, %267, %246 : vector<8x128xi32>
    %269 = arith.extui %268 : vector<8x128xi1> to vector<8x128xi32>
    %270 = arith.sitofp %269 : vector<8x128xi32> to vector<8x128xf32>
    %271 = arith.mulf %270, %264 : vector<8x128xf32>
    %cst_53 = arith.constant dense<0.000000e+00> : vector<8xf32>
    %272 = vector.multi_reduction <add>, %271, %cst_53 [1] : vector<8x128xf32> to vector<8xf32>
    %273 = vector.shape_cast %272 : vector<8xf32> to vector<8x1xf32>
    %cst_54 = arith.constant 0.000000e+00 : f32
    %274 = vector.broadcast %cst_54 : f32 to vector<8x1xf32>
    %275 = arith.subf %274, %273 : vector<8x1xf32>
    %c0_55 = arith.constant 0 : index
    %c0_56 = arith.constant 0 : index
    %276 = vector.load %arg11[%c0_55, %c0_56] : memref<1x128xf32, #tpu.memory_space<vmem>>, vector<1x128xf32>
    %277 = vector.broadcast %276 : vector<1x128xf32> to vector<8x128xf32>
    %278 = arith.mulf %270, %277 : vector<8x128xf32>
    %cst_57 = arith.constant dense<0.000000e+00> : vector<8xf32>
    %279 = vector.multi_reduction <add>, %278, %cst_57 [1] : vector<8x128xf32> to vector<8xf32>
    %280 = vector.shape_cast %279 : vector<8xf32> to vector<8x1xf32>
    %c0_58 = arith.constant 0 : index
    %c0_59 = arith.constant 0 : index
    %c0_60 = arith.constant 0 : index
    %281 = vector.load %arg12[%c0_58, %c0_59, %c0_60] : memref<1x8x1xi32, #tpu.memory_space<vmem>>, vector<1x8x1xi32>
    %282 = vector.shape_cast %281 : vector<1x8x1xi32> to vector<8x1xi32>
    %c1_i32 = arith.constant 1 : i32
    %283 = vector.broadcast %c1_i32 : i32 to vector<8x1xi32>
    %284 = arith.cmpi eq, %282, %283 : vector<8x1xi32>
    %285 = arith.extui %284 : vector<8x1xi1> to vector<8x1xi32>
    %286 = arith.sitofp %285 : vector<8x1xi32> to vector<8x1xf32>
    %287 = arith.mulf %286, %280 : vector<8x1xf32>
    %288 = arith.mulf %287, %275 : vector<8x1xf32>
    %289 = vector.shape_cast %288 : vector<8x1xf32> to vector<1x8x1xf32>
    %cst_61 = arith.constant dense<0.000000e+00> : vector<1xf32>
    %290 = vector.multi_reduction <add>, %289, %cst_61 [1, 2] : vector<1x8x1xf32> to vector<1xf32>
    %291 = vector.shape_cast %290 : vector<1xf32> to vector<1x1x1xf32>
    %292 = vector.extract %291[0, 0, 0] : f32 from vector<1x1x1xf32>
    %293 = vector.broadcast %292 : f32 to vector<1x1x1xf32>
    %c0_62 = arith.constant 0 : index
    %c0_63 = arith.constant 0 : index
    %c0_64 = arith.constant 0 : index
    %294 = vector.load %arg15[%c0_62, %c0_63, %c0_64] : memref<1x1x1xf32, #tpu.memory_space<vmem>>, vector<1x1x1xf32>
    tpu.vector_store %arg15[%c0_62, %c0_63, %c0_64], %293 {strides = array<i32>} : memref<1x1x1xf32, #tpu.memory_space<vmem>>, vector<1x1x1xf32>,
    %295 = arith.mulf %286, %280 : vector<8x1xf32>
    %296 = vector.shape_cast %295 : vector<8x1xf32> to vector<1x8x1xf32>
    %cst_65 = arith.constant dense<0.000000e+00> : vector<1xf32>
    %297 = vector.multi_reduction <add>, %296, %cst_65 [1, 2] : vector<1x8x1xf32> to vector<1xf32>
    %298 = vector.shape_cast %297 : vector<1xf32> to vector<1x1x1xf32>
    %299 = vector.extract %298[0, 0, 0] : f32 from vector<1x1x1xf32>
    %300 = vector.broadcast %299 : f32 to vector<1x1x1xf32>
    %c0_66 = arith.constant 0 : index
    %c0_67 = arith.constant 0 : index
    %c0_68 = arith.constant 0 : index
    %301 = vector.load %arg16[%c0_66, %c0_67, %c0_68] : memref<1x1x1xf32, #tpu.memory_space<vmem>>, vector<1x1x1xf32>
    tpu.vector_store %arg16[%c0_66, %c0_67, %c0_68], %300 {strides = array<i32>} : memref<1x1x1xf32, #tpu.memory_space<vmem>>, vector<1x1x1xf32>,
    return
  }
  func.func @transform_0(%arg0: i32) -> (i32, i32, i32) {
    %c0_i32 = arith.constant 0 : i32
    %c0_i32_0 = arith.constant 0 : i32
    %c0_i32_1 = arith.constant 0 : i32
    return %arg0, %c0_i32, %c0_i32_0 : i32, i32, i32
  }
  func.func @transform_1(%arg0: i32) -> (i32, i32, i32) {
    %c0_i32 = arith.constant 0 : i32
    %c0_i32_0 = arith.constant 0 : i32
    %c0_i32_1 = arith.constant 0 : i32
    return %arg0, %c0_i32, %c0_i32_0 : i32, i32, i32
  }
  func.func @transform_2(%arg0: i32) -> (i32, i32) {
    %c0_i32 = arith.constant 0 : i32
    %c0_i32_0 = arith.constant 0 : i32
    %c0_i32_1 = arith.constant 0 : i32
    return %c0_i32, %c0_i32_0 : i32, i32
  }
  func.func @transform_3(%arg0: i32) -> (i32, i32) {
    %c0_i32 = arith.constant 0 : i32
    %c0_i32_0 = arith.constant 0 : i32
    %c0_i32_1 = arith.constant 0 : i32
    return %c0_i32, %c0_i32_0 : i32, i32
  }
  func.func @transform_4(%arg0: i32) -> (i32, i32) {
    %c0_i32 = arith.constant 0 : i32
    %c0_i32_0 = arith.constant 0 : i32
    %c0_i32_1 = arith.constant 0 : i32
    return %c0_i32, %c0_i32_0 : i32, i32
  }
  func.func @transform_5(%arg0: i32) -> (i32, i32) {
    %c0_i32 = arith.constant 0 : i32
    %c0_i32_0 = arith.constant 0 : i32
    %c0_i32_1 = arith.constant 0 : i32
    return %c0_i32, %c0_i32_0 : i32, i32
  }
  func.func @transform_6(%arg0: i32) -> (i32, i32) {
    %c0_i32 = arith.constant 0 : i32
    %c0_i32_0 = arith.constant 0 : i32
    %c0_i32_1 = arith.constant 0 : i32
    return %c0_i32, %c0_i32_0 : i32, i32
  }
  func.func @transform_7(%arg0: i32) -> (i32, i32) {
    %c0_i32 = arith.constant 0 : i32
    %c0_i32_0 = arith.constant 0 : i32
    %c0_i32_1 = arith.constant 0 : i32
    return %c0_i32, %c0_i32_0 : i32, i32
  }
  func.func @transform_8(%arg0: i32) -> (i32, i32) {
    %c0_i32 = arith.constant 0 : i32
    %c0_i32_0 = arith.constant 0 : i32
    %c0_i32_1 = arith.constant 0 : i32
    return %c0_i32, %c0_i32_0 : i32, i32
  }
  func.func @transform_9(%arg0: i32) -> (i32, i32) {
    %c0_i32 = arith.constant 0 : i32
    %c0_i32_0 = arith.constant 0 : i32
    %c0_i32_1 = arith.constant 0 : i32
    return %c0_i32, %c0_i32_0 : i32, i32
  }
  func.func @transform_10(%arg0: i32) -> (i32, i32) {
    %c0_i32 = arith.constant 0 : i32
    %c0_i32_0 = arith.constant 0 : i32
    %c0_i32_1 = arith.constant 0 : i32
    return %c0_i32, %c0_i32_0 : i32, i32
  }
  func.func @transform_11(%arg0: i32) -> (i32, i32, i32) {
    %c0_i32 = arith.constant 0 : i32
    %c0_i32_0 = arith.constant 0 : i32
    %c0_i32_1 = arith.constant 0 : i32
    return %arg0, %c0_i32, %c0_i32_0 : i32, i32, i32
  }
  func.func @transform_12(%arg0: i32) -> (i32, i32, i32) {
    %c0_i32 = arith.constant 0 : i32
    %c0_i32_0 = arith.constant 0 : i32
    %c0_i32_1 = arith.constant 0 : i32
    return %arg0, %c0_i32, %c0_i32_0 : i32, i32, i32
  }
  func.func @transform_13(%arg0: i32) -> (i32, i32, i32) {
    %c0_i32 = arith.constant 0 : i32
    %c0_i32_0 = arith.constant 0 : i32
    %c0_i32_1 = arith.constant 0 : i32
    return %arg0, %c0_i32, %c0_i32_0 : i32, i32, i32
  }
  func.func @transform_14(%arg0: i32) -> (i32, i32, i32) {
    %c0_i32 = arith.constant 0 : i32
    %c0_i32_0 = arith.constant 0 : i32
    %c0_i32_1 = arith.constant 0 : i32
    return %arg0, %c0_i32, %c0_i32_0 : i32, i32, i32
  }
  func.func @transform_15(%arg0: i32) -> (i32, i32, i32) {
    %c0_i32 = arith.constant 0 : i32
    %c0_i32_0 = arith.constant 0 : i32
    %c0_i32_1 = arith.constant 0 : i32
    return %arg0, %c0_i32, %c0_i32_0 : i32, i32, i32
  }
}

</mosaic_0001>

<bundles_post_ra>
// kernel: tpu_custom_call.1
= control target key start
LH: loop header
LB: loop body
LE: loop exit
PB: predicated region body
PF: predicated region fallthrough
CT: control target
= control target key end

     0   :  { %s2911_s0 = inlined_call_operand.vmem [shape: bf16[2,8,64], index: 0, kind: input, shape index: {}]   ;;  %s2912_s1 = inlined_call_operand.vmem [shape: bf16[2,8,32], index: 1, kind: input, shape index: {}]   ;;  %s2913_s2 = inlined_call_operand.vmem [shape: bf16[64,32], index: 2, kind: input, shape index: {}]   ;;  %s2914_s3 = inlined_call_operand.vmem [shape: f32[1,32], index: 3, kind: input, shape index: {}]   ;;  %s2915_s4 = inlined_call_operand.vmem [shape: bf16[32,128], index: 4, kind: input, shape index: {}]   ;;  %s2916_s5 = inlined_call_operand.vmem [shape: f32[16,128], index: 5, kind: input, shape index: {}]   ;;  %s2917_s6 = inlined_call_operand.vmem [shape: f32[1,128], index: 6, kind: input, shape index: {}]   ;;  %s2918_s7 = inlined_call_operand.vmem [shape: bf16[16,128], index: 7, kind: input, shape index: {}]   ;;  %s2919_s8 = inlined_call_operand.vmem [shape: bf16[16,128], index: 8, kind: input, shape index: {}]   ;;  %s2920_s9 = inlined_call_operand.vmem [shape: f32[1,128], index: 9, kind: input, shape index: {}]   ;;  %s2921_s10 = inlined_call_operand.vmem [shape: f32[1,128], index: 10, kind: input, shape index: {}]   ;;  %s2922_s11 = inlined_call_operand.vmem [shape: s32[2,8,1], index: 11, kind: input, shape index: {}]   ;;  %s2923_s12 = inlined_call_operand.vmem [shape: s32[2,8,1], index: 12, kind: input, shape index: {}]   ;;  %s2924_s13 = inlined_call_operand.hbm [shape: f32[2,8,128], index: 13, kind: output, shape index: {0}]   ;;  %s2925_s14 = inlined_call_operand.vmem [shape: f32[2,1,1], index: 14, kind: output, shape index: {1}]   ;;  %s2926_s15 = inlined_call_operand.vmem [shape: f32[2,1,1], index: 15, kind: output, shape index: {2}]  }
   0x1   :  { %2932 = sst [smem:[#allocation10_spill]] %s2911_s0 }
   0x2   :  { %2933 = sst [smem:[#allocation11_spill]] %s2912_s1 }
   0x3   :  { %2934 = sst [smem:[#allocation12_spill]] %s2913_s2 }
   0x4   :  { %21 = vsyncpa [#allocation3], 0 }
   0x5   :  { %23 = vsyncpa [#allocation3 + $0x1], 0  ;;  %s2512_s18 = smov 0   ;;  %s2514_s19 = smov 0  }
   0x6   :  { %s2516_s20 = smov 0   ;;  %s2518_s21 = smov 0  }
   0x7 LB: > { %2935 = sst [smem:[#allocation5_spill]] %s2409_s18  ;;  %s2533_s22 = sadd.s32 4294967295, %s2421_s21   ;;  %s2421_s21 = sphi %s2518_s21, %s2947_s21   ;;  %s2417_s20 = sphi %s2516_s20, %s2949_s20   ;;  %s2413_s19 = sphi %s2514_s19, %s2951_s19   ;;  %s2409_s18 = sphi %s2512_s18, %s2950_s18  }
   0x8   : > { %2936 = sst [smem:[#allocation6_spill]] %s2417_s20  ;;  %s2043_s23 = sadd.s32 4294967294, %s2421_s21  }
   0x9   : > { %s2537_s24 = sadd.s32 1, %s2421_s21   ;;  %s329_s25 = sadd.s32 1, %s2417_s20 }
   0xa   : > { %2937 = sst [smem:[#allocation7_spill]] %s2537_s24  ;;  %s326_s26 = ssub.s32 %s2421_s21, %s2537_s24 }
   0xb   : > { %p339_p0 = scmp.ne.s32.totalorder %s2417_s20, %s2413_s19  ;;  %p327_p1 = scmp.eq.s32.totalorder %s326_s26, 0 }
   0xc   : > { %p340_p2 = scmp.eq.s32.totalorder %s2533_s22, 1  ;;  %p345_p3 = scmp.ne.s32.totalorder %s2413_s19, %s2409_s18 }
   0xd   : > { %p346_p4 = scmp.eq.s32.totalorder %s2043_s23, 1  ;;  %p2046_p7 = scmp.ge.s32.totalorder %s2421_s21, 1 }
   0xe   : > { %s2548_s27 = scalar_select %p327_p1, %s2417_s20, %s329_s25  }
   0xf   : > { %p2550_p5 = por %p340_p2, %p339_p0  ;;  %p2554_p6 = por %p346_p4, %p345_p3 }
  0x10   : > { %2938 = sst [smem:[#allocation8_spill]] %s2548_s27  ;;  %p471_p8 = scmp.lt.s32.totalorder %s2421_s21, 3 }
  0x11   : > { %s2940_s29 = scalar_select %p2554_p6, 1, 0 }
  0x12   : > { %p472_p9 = pnand %p2046_p7, %p471_p8 }
  0x13   : > { %2941 = sst [smem:[#allocation9_spill]] %s2940_s29  ;;  %p536_p10 = scmp.lt.s32.totalorder (!%p472_p9), %s2533_s22, 1 }
  0x14   : > { %475 = sbr.rel (%p472_p9) target bundleno = 7758 (0x1e4e), region = 72  ;;  %s2942_s2 = sld [smem:[#allocation12_spill]] (!%p472_p9) }
  0x15   : > { %s2943_s1 = sld [smem:[#allocation11_spill]] (!%p472_p9)  ;;  %s2425_s29 = smov (!%p472_p9), 32  }
  0x16   : > { %s2944_s0 = sld [smem:[#allocation10_spill]] (!%p472_p9)  ;;  %s2426_s20 = smov (!%p472_p9), 64  }
  0x19   : > { %v2423_v1 = vmov 0.0   ;;  %vm2424_vm0 = vmmov 0   ;;  %s2573_s25 = scalar_select %p536_p10, %s2533_s22, 1  ;;  %vm600_vm1 = vcmask 523264   ;;  %v2289_v7 = vld [vmem:[%s2915_s4 + $0x8] sm:$0xff]   ;;  %vm650_vm2 = vcmask 261120  }
  0x1a   : > { %v2284_v0 = vld [vmem:[%s2942_s2 + $0x18] sm:$0xff]   ;;  %2132 = vmatprep.subr.bf16.mxu0 %v2423_v1  ;;  %2144 = vmatprep.subr.bf16.mxu1 %v2423_v1  ;;  %v2285_v2 = vld [vmem:[%s2942_s2 + $0x10] sm:$0xff]   ;;  %v2286_v3 = vld [vmem:[%s2942_s2 + $0x8] sm:$0xff]   ;;  %vm844_vm3 = vcmask 1040384   ;;  %vm765_vm4 = vcmask 130048   ;;  %vm1668_vm5 = vcmask 1041408  }
  0x1b   : > { %2133 = vmatpush3.bf16.msra.mxu0 %v2284_v0  ;;  %2140 = vmatprep.mubr.msk.bf16.mxu0 %vm2424_vm0, %v2423_v1  ;;  %s2048_s16 = sshll.u32 %s2573_s25, 2  ;;  %v2287_v5 = vld [vmem:[%s2942_s2] sm:$0xff]   ;;  %v2610_v15 = vld [vmem:[%s2916_s5 + $0x8] sm:$0xff]  ;;  %vm1670_vm6 = vcmask 1042432   ;;  %vm1672_vm7 = vcmask 1043456   ;;  %vm1674_vm8 = vcmask 1044480  }
  0x1c   : > { %2134 = vmatprep.subr.bf16.mxu0 %v2423_v1  ;;  %2145 = vmatpush3.bf16.msra.mxu1 %v2284_v0  ;;  %s543_s27 = scalar_lea.vmem %s2943_s1, %s2048_s16  ;;  %s539_s18 = scalar_lea.vmem %s2944_s0, %s2048_s16  ;;  %v2052_v8 = vld [vmem:[%s2914_s3] ss:$0 sm:$0xff]  ;;  %vm1676_vm9 = vcmask 1045504   ;;  %vm1678_vm10 = vcmask 1046528   ;;  %vm1858_vm14 = vcmask 7168  }
  0x1d   : > { %2146 = vmatprep.subr.bf16.mxu1 %v2423_v1  ;;  %2152 = vmatprep.mubr.msk.bf16.mxu1 %vm2424_vm0, %v2423_v1  ;;  %v2288_v4 = vld [vmem:[%s543_s27] ss:$0 sps:$4 sm:$0xff]   ;;  %s2429_s16 = smov 96   ;;  %s2431_s0 = smov [#allocation2]  }
  0x1e   : > { %648 = vrot.lane.b32.xlu0 %v2288_v4, %s2425_s29  ;;  %v559_v6 = vld [vmem:[%s539_s18] sm:$0xf]  ;;  %s2427_s18 = smov 80   ;;  %s2428_s29 = smov 16  }
  0x1f   : > { %2135 = vmatpush3.bf16.msra.mxu0 %v2285_v2  ;;  %v2617_v18 = vld [vmem:[%s2916_s5] sm:$0xff]  ;;  %s2365_s1 = sshll.u32 %s2431_s0, 4  ;;  %s2366_s1 = int_to_ptr.vmem [resolvable:$false] %s2365_s1 }
  0x20   : > { %2136 = vmatprep.subr.bf16.mxu0 %v2423_v1  ;;  %2147 = vmatpush3.bf16.msra.mxu1 %v2285_v2  ;;  %v2290_v19 = vld [vmem:[%s2915_s4] sm:$0xff]   ;;  %s2367_s2 = scalar_lea.vmem %s2366_s1, 256 }
  0x21   : > { %2148 = vmatprep.subr.bf16.mxu1 %v2423_v1  ;;  %v2060_v28 = vld [vmem:[%s2917_s6] ss:$0 sm:$0xff] }
  0x23   : > { %2137 = vmatpush3.bf16.msra.mxu0 %v2286_v3 }
  0x24   : > { %2138 = vmatprep.subr.bf16.mxu0 %v2423_v1  ;;  %2149 = vmatpush3.bf16.msra.mxu1 %v2286_v3 }
  0x25   : > { %2150 = vmatprep.subr.bf16.mxu1 %v2423_v1 }
  0x27   : > { %2139 = vmatpush3.bf16.msra.mxu0 %v2287_v5 }
  0x28   : > { %2151 = vmatpush3.bf16.msra.mxu1 %v2287_v5  ;;  %2156 = vmatprep.subr.bf16.mxu0 %v2423_v1 }
  0x29   : > { %2164 = vmatprep.subr.mxu1 %v2423_v1 }
  0x2a   : > { %2141 = vmatmul.mubr.msk.bf16.vlgmr.msra.gmra.mxu0 %vm600_vm1, %v559_v6 }
  0x2b   : > { %2160 = vmatprep.mubr.msk.bf16.mxu0 %vm2424_vm0, %v2423_v1  ;;  %2157 = vmatpush3.bf16.msra.mxu0 %v2289_v7 }
  0x2c   : > { %2158 = vmatprep.subr.bf16.mxu0 %v2423_v1 }
  0x2f   : > { %2159 = vmatpush3.bf16.msra.mxu0 %v2290_v19 }
  0x30   : > { %2178 = vmatprep.subr.mxu0 %v2423_v1 }
  0x90   : > { %v649_v12 = vpop.permute.xlu0 %648 }
  0xea   : > { %v638_v9 = vpop.f32.mrf.mxu0 }
  0xeb   : > { %v639_v10 = vadd.f32 %v2052_v8, %v638_v9 }
  0xec   : > { %v2142_v11 = vpop.f32.mrf.mxu0 }
  0xed   : > { %v644_v13 = vpack.c.bf16 %v639_v10, %v639_v10 }
  0xee   : > { %v641_v14 = vpop.f32.mrf.mxu0 }
  0xef   : > { %v653_v16 = vsel %vm650_vm2, %v644_v13, %v649_v12 }
  0xf0   : > { %v2143_v17 = vpop.f32.mrf.mxu0  ;;  %2153 = vmatmul.mubr.msk.bf16.vlgmr.msra.gmra.mxu1 %vm600_vm1, %v653_v16 }
  0xf1   : > { %2165 = vmatpush3.msra.mxu1 %v2610_v15  ;;  %2168 = vmatprep.mubr.msk.f32.mxu1 %vm2424_vm0, %v2423_v1 }
  0xf2   : > { %2166 = vmatprep.subr.mxu1 %v2423_v1 }
  0xf3   : > { %2167 = vmatpush3.msra.mxu1 %v2617_v18 }
  0xf4   : > { %2171 = vmatprep.subr.mxu1 %v2423_v1 }
  0xf8   : > { %2169 = vmatmul.mubr.f32.vlgmr.msra.gmra.mxu1 %v2423_v1 }
  0xf9   : > { %2172 = vmatpush3.msra.mxu1 %v2610_v15  ;;  %2175 = vmatprep.mubr.msk.f32.mxu1 %vm2424_vm0, %v2423_v1 }
  0xfa   : > { %2173 = vmatprep.subr.mxu1 %v2423_v1 }
  0xfb   : > { %2174 = vmatpush3.msra.mxu1 %v2617_v18 }
  0xfc   : > { %2185 = vmatprep.subr.mxu1 %v2423_v1 }
 0x1b0   : > { %v690_v20 = vpop.f32.mrf.mxu1 }
 0x1b1   : > { %v691_v21 = vadd.f32 %v2052_v8, %v690_v20 }
 0x1b2   : > { %v2154_v22 = vpop.f32.mrf.mxu1 }
 0x1b3   : > { %v696_v23 = vpack.c.bf16 %v691_v21, %v691_v21 }
 0x1b4   : > { %v693_v24 = vpop.f32.mrf.mxu1 }
 0x1b5   : > { %2161 = vmatmul.mubr.msk.bf16.vlgmr.msra.gmra.mxu0 %vm650_vm2, %v696_v23 }
 0x1b6   : > { %v2155_v25 = vpop.f32.mrf.mxu1  ;;  %2179 = vmatpush3.msra.mxu0 %v2610_v15  ;;  %2182 = vmatprep.mubr.msk.f32.mxu0 %vm2424_vm0, %v2423_v1 }
 0x1b7   : > { %2180 = vmatprep.subr.mxu0 %v2423_v1 }
 0x1b8   : > { %v835_v26 = vpop.f32.mrf.mxu1  ;;  %2181 = vmatpush3.msra.mxu0 %v2617_v18 }
 0x1b9   : > { %847 = vrot.lane.b32.xlu1 %v835_v26, %s2426_s20  ;;  %2192 = vmatprep.subr.mxu0 %v2423_v1 }
 0x1ba   : > { %v2170_v27 = vpop.f32.mrf.mxu1 }
 0x22b   : > { %v848_v35 = vpop.permute.xlu1 %847 }
 0x22c   : > { %v850_v37 = vsel %vm844_vm3, %v835_v26, %v848_v35 }
 0x275   : > { %v757_v29 = vpop.f32.mrf.mxu0 }
 0x276   : > { %v2647_v30 = vadd.f32 %v2060_v28, %v757_v29 }
 0x277   : > { %v2162_v31 = vpop.f32.mrf.mxu0 }
 0x278   : > { %v840_v32 = vrot.slane %v2647_v30, 6  ;;  %v953_v51 = vrot.slane %v2647_v30, 5  ;;  %v951_v58 = vrot.slane %v2647_v30, 1  ;;  %v1065_v11 = vrot.slane %v2647_v30, 4 }
 0x279   : > { %v760_v33 = vpop.f32.mrf.mxu0  ;;  %v1063_v20 = vrot.slane %v2647_v30, 2 }
 0x27a   : > { %841 = vrot.lane.b32.xlu0 %v840_v32, %s2426_s20 }
 0x27b   : > { %v2163_v34 = vpop.f32.mrf.mxu0 }
 0x2ec   : > { %v842_v36 = vpop.permute.xlu0 %841 }
 0x2ed   : > { %v845_v38 = vsel %vm844_vm3, %v2647_v30, %v842_v36 }
 0x2ee   : > { %v851_v39 = vadd.f32 %v850_v37, %v845_v38  ;;  %v1175_v38 = vrot.slane %v2647_v30, 3 }
 0x2f0   : > { %2293 = vtanh.f32 %v851_v39  ;;  %v2064_v41 = vmul.f32 -1.442695, %v851_v39 }
 0x2f2   : > { %2295 = vpow2.f32 %v2064_v41 }
 0x2fd   : > { %v2294_v40 = vpop.eup %2293 }
 0x2fe   : > { %861 = vrot.lane.b32.xlu1 %v2294_v40, %s2427_s18 }
 0x2ff   : > { %v2296_v42 = vpop.eup %2295 }
 0x300   : > { %v855_v43 = vadd.f32 1.0, %v2296_v42 }
 0x302   : > { %2297 = vrcp.f32 %v855_v43 }
 0x30f   : > { %v2298_v44 = vpop.eup %2297 }
 0x310   : > { %v859_v47 = vmul.f32 0.0, %v2298_v44 }
 0x370   : > { %v862_v45 = vpop.permute.xlu1 %861 }
 0x371   : > { %v864_v46 = vmul.f32 %v2298_v44, %v862_v45 }
 0x373   : > { %866 = vrot.lane.b32.xlu0 %v864_v46, %s2428_s29 }
 0x3e5   : > { %v867_v48 = vpop.permute.xlu0 %866 }
 0x3e6   : > { %v869_v49 = vadd.f32 %v867_v48, %v859_v47 }
 0x3e8   : > { %2299 = vtanh.f32 %v869_v49 }
 0x3f5   : > { %v2300_v50 = vpop.eup %2299 }
 0x3f6   : > { %872 = vrot.lane.b32.xlu1 %v2300_v50, %s2428_s29 }
 0x3fa   : > { %954 = vrot.lane.b32.xlu1 %v953_v51, %s2426_s20 }
 0x468   : > { %v873_v52 = vpop.permute.xlu1 %872 }
 0x469   : > { %v2663_v53 = vmul.f32 %v2298_v44, %v873_v52 }
 0x46b   : > { %877 = vrot.lane.b32.xlu0 %v2663_v53, %s2429_s16 }
 0x46c   : > { %v955_v57 = vpop.permute.xlu1 %954 }
 0x46d   : > { %v957_v60 = vsel %vm844_vm3, %v951_v58, %v955_v57 }
 0x4dd   : > { %v878_v54 = vpop.permute.xlu0 %877 }
 0x4de   : > { %2176 = vmatmul.mubr.msk.f32.vlgmr.msra.gmra.mxu1 %vm765_vm4, %v878_v54 }
 0x4df   : > { %2186 = vmatpush3.msra.mxu1 %v2610_v15  ;;  %2189 = vmatprep.mubr.msk.f32.mxu1 %vm2424_vm0, %v2423_v1 }
 0x4e0   : > { %2187 = vmatprep.subr.mxu1 %v2423_v1 }
 0x4e1   : > { %2188 = vmatpush3.msra.mxu1 %v2617_v18 }
 0x4e2   : > { %2199 = vmatprep.subr.mxu1 %v2423_v1 }
 0x59e   : > { %v947_v55 = vpop.f32.mrf.mxu1 }
 0x59f   : > { %959 = vrot.lane.b32.xlu0 %v947_v55, %s2426_s20 }
 0x5a0   : > { %v2177_v56 = vpop.f32.mrf.mxu1 }
 0x611   : > { %v960_v59 = vpop.permute.xlu0 %959 }
 0x612   : > { %v962_v61 = vsel %vm844_vm3, %v947_v55, %v960_v59 }
 0x613   : > { %v963_v62 = vadd.f32 %v962_v61, %v957_v60 }
 0x615   : > { %2301 = vtanh.f32 %v963_v62  ;;  %v2066_v0 = vmul.f32 -1.442695, %v963_v62 }
 0x617   : > { %2303 = vpow2.f32 %v2066_v0 }
 0x622   : > { %v2302_v63 = vpop.eup %2301 }
 0x623   : > { %973 = vrot.lane.b32.xlu1 %v2302_v63, %s2427_s18 }
 0x624   : > { %v2304_v2 = vpop.eup %2303 }
 0x625   : > { %v967_v3 = vadd.f32 1.0, %v2304_v2 }
 0x627   : > { %2305 = vrcp.f32 %v967_v3 }
 0x634   : > { %v2306_v4 = vpop.eup %2305 }
 0x635   : > { %v971_v7 = vmul.f32 %v2306_v4, %v869_v49 }
 0x695   : > { %v974_v5 = vpop.permute.xlu1 %973 }
 0x696   : > { %v976_v6 = vmul.f32 %v2306_v4, %v974_v5 }
 0x698   : > { %978 = vrot.lane.b32.xlu0 %v976_v6, %s2428_s29 }
 0x70a   : > { %v979_v8 = vpop.permute.xlu0 %978 }
 0x70b   : > { %v981_v9 = vadd.f32 %v979_v8, %v971_v7 }
 0x70d   : > { %2307 = vtanh.f32 %v981_v9 }
 0x71a   : > { %v2308_v10 = vpop.eup %2307 }
 0x71b   : > { %984 = vrot.lane.b32.xlu1 %v2308_v10, %s2428_s29 }
 0x71f   : > { %1066 = vrot.lane.b32.xlu1 %v1065_v11, %s2426_s20 }
 0x78d   : > { %v985_v12 = vpop.permute.xlu1 %984 }
 0x78e   : > { %v2687_v13 = vmul.f32 %v2306_v4, %v985_v12 }
 0x790   : > { %989 = vrot.lane.b32.xlu0 %v2687_v13, %s2429_s16  ;;  %v1652_v39 = vrot.slane %v2687_v13, 7 }
 0x791   : > { %v1067_v19 = vpop.permute.xlu1 %1066 }
 0x792   : > { %v1069_v22 = vsel %vm844_vm3, %v1063_v20, %v1067_v19  ;;  %v1667_v43 = vsel %vm844_vm3, %v2663_v53, %v1652_v39 }
 0x802   : > { %v990_v14 = vpop.permute.xlu0 %989 }
 0x803   : > { %2183 = vmatmul.mubr.msk.f32.vlgmr.msra.gmra.mxu0 %vm765_vm4, %v990_v14 }
 0x804   : > { %2193 = vmatpush3.msra.mxu0 %v2610_v15  ;;  %2196 = vmatprep.mubr.msk.f32.mxu0 %vm2424_vm0, %v2423_v1 }
 0x805   : > { %2194 = vmatprep.subr.mxu0 %v2423_v1 }
 0x806   : > { %2195 = vmatpush3.msra.mxu0 %v2617_v18 }
 0x807   : > { %2206 = vmatprep.subr.mxu0 %v2423_v1 }
 0x8c3   : > { %v1059_v16 = vpop.f32.mrf.mxu0 }
 0x8c4   : > { %1071 = vrot.lane.b32.xlu0 %v1059_v16, %s2426_s20 }
 0x8c5   : > { %v2184_v17 = vpop.f32.mrf.mxu0 }
 0x936   : > { %v1072_v21 = vpop.permute.xlu0 %1071 }
 0x937   : > { %v1074_v23 = vsel %vm844_vm3, %v1059_v16, %v1072_v21 }
 0x938   : > { %v1075_v24 = vadd.f32 %v1074_v23, %v1069_v22 }
 0x93a   : > { %2309 = vtanh.f32 %v1075_v24  ;;  %v2068_v26 = vmul.f32 -1.442695, %v1075_v24 }
 0x93c   : > { %2311 = vpow2.f32 %v2068_v26 }
 0x947   : > { %v2310_v25 = vpop.eup %2309 }
 0x948   : > { %1085 = vrot.lane.b32.xlu1 %v2310_v25, %s2427_s18 }
 0x949   : > { %v2312_v27 = vpop.eup %2311 }
 0x94a   : > { %v1079_v28 = vadd.f32 1.0, %v2312_v27 }
 0x94c   : > { %2313 = vrcp.f32 %v1079_v28 }
 0x959   : > { %v2314_v29 = vpop.eup %2313 }
 0x95a   : > { %v1083_v34 = vmul.f32 %v2314_v29, %v981_v9 }
 0x9ba   : > { %v1086_v31 = vpop.permute.xlu1 %1085 }
 0x9bb   : > { %v1088_v33 = vmul.f32 %v2314_v29, %v1086_v31 }
 0x9bd   : > { %1090 = vrot.lane.b32.xlu0 %v1088_v33, %s2428_s29 }
 0xa2f   : > { %v1091_v35 = vpop.permute.xlu0 %1090 }
 0xa30   : > { %v1093_v36 = vadd.f32 %v1091_v35, %v1083_v34 }
 0xa32   : > { %2315 = vtanh.f32 %v1093_v36 }
 0xa3f   : > { %v2316_v37 = vpop.eup %2315 }
 0xa40   : > { %1096 = vrot.lane.b32.xlu1 %v2316_v37, %s2428_s29 }
 0xa44   : > { %1177 = vrot.lane.b32.xlu1 %v1175_v38, %s2426_s20 }
 0xab2   : > { %v1097_v40 = vpop.permute.xlu1 %1096 }
 0xab3   : > { %v2710_v41 = vmul.f32 %v2314_v29, %v1097_v40 }
 0xab5   : > { %v1654_v42 = vrot.slane %v2710_v41, 6  ;;  %1101 = vrot.lane.b32.xlu0 %v2710_v41, %s2429_s16 }
 0xab6   : > { %v1178_v48 = vpop.permute.xlu1 %1177 }
 0xab7   : > { %v1669_v44 = vsel %vm1668_vm5, %v1667_v43, %v1654_v42  ;;  %v1180_v50 = vsel %vm844_vm3, %v1175_v38, %v1178_v48 }
 0xb27   : > { %v1102_v45 = vpop.permute.xlu0 %1101 }
 0xb28   : > { %2190 = vmatmul.mubr.msk.f32.vlgmr.msra.gmra.mxu1 %vm765_vm4, %v1102_v45 }
 0xb29   : > { %2200 = vmatpush3.msra.mxu1 %v2610_v15  ;;  %2203 = vmatprep.mubr.msk.f32.mxu1 %vm2424_vm0, %v2423_v1 }
 0xb2a   : > { %2201 = vmatprep.subr.mxu1 %v2423_v1 }
 0xb2b   : > { %2202 = vmatpush3.msra.mxu1 %v2617_v18 }
 0xb2c   : > { %2213 = vmatprep.subr.mxu1 %v2423_v1 }
 0xbe8   : > { %v1171_v46 = vpop.f32.mrf.mxu1 }
 0xbe9   : > { %1182 = vrot.lane.b32.xlu0 %v1171_v46, %s2426_s20 }
 0xbea   : > { %v2191_v47 = vpop.f32.mrf.mxu1 }
 0xc5b   : > { %v1183_v49 = vpop.permute.xlu0 %1182 }
 0xc5c   : > { %v1185_v52 = vsel %vm844_vm3, %v1171_v46, %v1183_v49 }
 0xc5d   : > { %v1186_v54 = vadd.f32 %v1185_v52, %v1180_v50 }
 0xc5f   : > { %2317 = vtanh.f32 %v1186_v54  ;;  %v2070_v56 = vmul.f32 -1.442695, %v1186_v54 }
 0xc61   : > { %2319 = vpow2.f32 %v2070_v56 }
 0xc6c   : > { %v2318_v55 = vpop.eup %2317 }
 0xc6d   : > { %1196 = vrot.lane.b32.xlu1 %v2318_v55, %s2427_s18 }
 0xc6e   : > { %v2320_v57 = vpop.eup %2319 }
 0xc6f   : > { %v1190_v59 = vadd.f32 1.0, %v2320_v57 }
 0xc71   : > { %2321 = vrcp.f32 %v1190_v59 }
 0xc7e   : > { %v2322_v60 = vpop.eup %2321 }
 0xc7f   : > { %v1194_v63 = vmul.f32 %v2322_v60, %v1093_v36 }
 0xcdf   : > { %v1197_v61 = vpop.permute.xlu1 %1196 }
 0xce0   : > { %v1199_v62 = vmul.f32 %v2322_v60, %v1197_v61 }
 0xce2   : > { %1201 = vrot.lane.b32.xlu0 %v1199_v62, %s2428_s29 }
 0xd54   : > { %v1202_v0 = vpop.permute.xlu0 %1201 }
 0xd55   : > { %v1204_v2 = vadd.f32 %v1202_v0, %v1194_v63 }
 0xd57   : > { %2323 = vtanh.f32 %v1204_v2 }
 0xd64   : > { %v2324_v3 = vpop.eup %2323 }
 0xd65   : > { %1207 = vrot.lane.b32.xlu1 %v2324_v3, %s2428_s29 }
 0xd69   : > { %1287 = vrot.lane.b32.xlu1 %v1063_v20, %s2426_s20 }
 0xdd7   : > { %v1208_v4 = vpop.permute.xlu1 %1207 }
 0xdd8   : > { %v2734_v5 = vmul.f32 %v2322_v60, %v1208_v4 }
 0xdda   : > { %v1656_v6 = vrot.slane %v2734_v5, 5  ;;  %1212 = vrot.lane.b32.xlu0 %v2734_v5, %s2429_s16 }
 0xddb   : > { %v1288_v12 = vpop.permute.xlu1 %1287 }
 0xddc   : > { %v1671_v7 = vsel %vm1670_vm6, %v1669_v44, %v1656_v6  ;;  %v1290_v16 = vsel %vm844_vm3, %v1065_v11, %v1288_v12 }
 0xe4c   : > { %v1213_v8 = vpop.permute.xlu0 %1212 }
 0xe4d   : > { %2197 = vmatmul.mubr.msk.f32.vlgmr.msra.gmra.mxu0 %vm765_vm4, %v1213_v8 }
 0xe4e   : > { %2207 = vmatpush3.msra.mxu0 %v2610_v15  ;;  %2210 = vmatprep.mubr.msk.f32.mxu0 %vm2424_vm0, %v2423_v1 }
 0xe4f   : > { %2208 = vmatprep.subr.mxu0 %v2423_v1 }
 0xe50   : > { %2209 = vmatpush3.msra.mxu0 %v2617_v18 }
 0xe51   : > { %2220 = vmatprep.subr.bf16.mxu0 %v2423_v1 }
 0xf0d   : > { %v1282_v9 = vpop.f32.mrf.mxu0 }
 0xf0e   : > { %1292 = vrot.lane.b32.xlu0 %v1282_v9, %s2426_s20 }
 0xf0f   : > { %v2198_v10 = vpop.f32.mrf.mxu0 }
 0xf80   : > { %v1293_v14 = vpop.permute.xlu0 %1292 }
 0xf81   : > { %v1295_v17 = vsel %vm844_vm3, %v1282_v9, %v1293_v14 }
 0xf82   : > { %v1296_v19 = vadd.f32 %v1295_v17, %v1290_v16 }
 0xf84   : > { %2325 = vtanh.f32 %v1296_v19  ;;  %v2072_v21 = vmul.f32 -1.442695, %v1296_v19 }
 0xf86   : > { %2327 = vpow2.f32 %v2072_v21 }
 0xf91   : > { %v2326_v20 = vpop.eup %2325 }
 0xf92   : > { %1306 = vrot.lane.b32.xlu1 %v2326_v20, %s2427_s18  ;;  %v1616_v20 = vrot.slane %v2647_v30, 7 }
 0xf93   : > { %v2328_v22 = vpop.eup %2327 }
 0xf94   : > { %v1300_v23 = vadd.f32 1.0, %v2328_v22 }
 0xf96   : > { %2329 = vrcp.f32 %v1300_v23 }
 0xfa3   : > { %v2330_v24 = vpop.eup %2329 }
 0xfa4   : > { %v1304_v27 = vmul.f32 %v2330_v24, %v1204_v2 }
0x1004   : > { %v1307_v25 = vpop.permute.xlu1 %1306 }
0x1005   : > { %v1309_v26 = vmul.f32 %v2330_v24, %v1307_v25 }
0x1007   : > { %1311 = vrot.lane.b32.xlu0 %v1309_v26, %s2428_s29 }
0x1079   : > { %v1312_v28 = vpop.permute.xlu0 %1311 }
0x107a   : > { %v1314_v11 = vadd.f32 %v1312_v28, %v1304_v27 }
0x107c   : > { %2331 = vtanh.f32 %v1314_v11 }
0x1089   : > { %v2332_v29 = vpop.eup %2331 }
0x108a   : > { %1317 = vrot.lane.b32.xlu1 %v2332_v29, %s2428_s29 }
0x108e   : > { %1397 = vrot.lane.b32.xlu1 %v951_v58, %s2426_s20 }
0x10fc   : > { %v1318_v31 = vpop.permute.xlu1 %1317 }
0x10fd   : > { %v2760_v33 = vmul.f32 %v2330_v24, %v1318_v31 }
0x10ff   : > { %v1658_v34 = vrot.slane %v2760_v33, 4  ;;  %1322 = vrot.lane.b32.xlu0 %v2760_v33, %s2429_s16 }
0x1100   : > { %v1398_v38 = vpop.permute.xlu1 %1397 }
0x1101   : > { %v1673_v35 = vsel %vm1672_vm7, %v1671_v7, %v1658_v34  ;;  %v1400_v40 = vsel %vm844_vm3, %v953_v51, %v1398_v38 }
0x1171   : > { %v1323_v36 = vpop.permute.xlu0 %1322 }
0x1172   : > { %2204 = vmatmul.mubr.msk.f32.vlgmr.msra.gmra.mxu1 %vm765_vm4, %v1323_v36 }
0x1173   : > { %2214 = vmatpush3.msra.mxu1 %v2610_v15  ;;  %2217 = vmatprep.mubr.msk.f32.mxu1 %vm2424_vm0, %v2423_v1 }
0x1174   : > { %2215 = vmatprep.subr.mxu1 %v2423_v1 }
0x1175   : > { %2216 = vmatpush3.msra.mxu1 %v2617_v18 }
0x1176   : > { %2226 = vmatprep.subr.bf16.mxu1 %v2423_v1 }
0x1232   : > { %v1392_v58 = vpop.f32.mrf.mxu1 }
0x1233   : > { %1402 = vrot.lane.b32.xlu0 %v1392_v58, %s2426_s20 }
0x1234   : > { %v2205_v37 = vpop.f32.mrf.mxu1 }
0x12a5   : > { %v1403_v39 = vpop.permute.xlu0 %1402 }
0x12a6   : > { %v1405_v15 = vsel %vm844_vm3, %v1392_v58, %v1403_v39 }
0x12a7   : > { %v1406_v42 = vadd.f32 %v1405_v15, %v1400_v40 }
0x12a9   : > { %2333 = vtanh.f32 %v1406_v42  ;;  %v2074_v18 = vmul.f32 -1.442695, %v1406_v42  ;;  %v2291_v42 = vld [vmem:[%s2918_s7] sm:$0xff]  }
0x12ab   : > { %2335 = vpow2.f32 %v2074_v18 }
0x12b6   : > { %v2334_v43 = vpop.eup %2333 }
0x12b7   : > { %1416 = vrot.lane.b32.xlu1 %v2334_v43, %s2427_s18  ;;  %v2292_v43 = vld [vmem:[%s2919_s8] sm:$0xff]  }
0x12b8   : > { %v2336_v44 = vpop.eup %2335 }
0x12b9   : > { %v1410_v45 = vadd.f32 1.0, %v2336_v44 }
0x12bb   : > { %2337 = vrcp.f32 %v1410_v45 }
0x12c8   : > { %v2338_v46 = vpop.eup %2337 }
0x12c9   : > { %v1414_v49 = vmul.f32 %v2338_v46, %v1314_v11 }
0x1329   : > { %v1417_v47 = vpop.permute.xlu1 %1416 }
0x132a   : > { %v1419_v48 = vmul.f32 %v2338_v46, %v1417_v47 }
0x132c   : > { %1421 = vrot.lane.b32.xlu0 %v1419_v48, %s2428_s29 }
0x139e   : > { %v1422_v50 = vpop.permute.xlu0 %1421 }
0x139f   : > { %v1424_v51 = vadd.f32 %v1422_v50, %v1414_v49  ;;  %v1682_v49 = vrot.slane %v2760_v33, 6 }
0x13a1   : > { %2339 = vtanh.f32 %v1424_v51 }
0x13ae   : > { %v2340_v52 = vpop.eup %2339 }
0x13af   : > { %1427 = vrot.lane.b32.xlu1 %v2340_v52, %s2428_s29 }
0x13b3   : > { %1507 = vrot.lane.b32.xlu1 %v2647_v30, %s2426_s20 }
0x1421   : > { %v1428_v54 = vpop.permute.xlu1 %1427 }
0x1422   : > { %v2783_v55 = vmul.f32 %v2338_v46, %v1428_v54 }
0x1424   : > { %v1660_v56 = vrot.slane %v2783_v55, 3  ;;  %1432 = vrot.lane.b32.xlu0 %v2783_v55, %s2429_s16  ;;  %v1680_v47 = vrot.slane %v2783_v55, 7  ;;  %v1688_v55 = vrot.slane %v2663_v53, 2 }
0x1425   : > { %v1508_v62 = vpop.permute.xlu1 %1507 }
0x1426   : > { %v2789_v57 = vsel %vm1674_vm8, %v1673_v35, %v1660_v56  ;;  %v1510_v0 = vsel %vm844_vm3, %v840_v32, %v1508_v62  ;;  %v1684_v56 = vrot.slane %v2710_v41, 4 }
0x1496   : > { %v1433_v59 = vpop.permute.xlu0 %1432 }
0x1497   : > { %2211 = vmatmul.mubr.msk.f32.vlgmr.msra.gmra.mxu0 %vm765_vm4, %v1433_v59 }
0x1498   : > { %2222 = vmatprep.mubr.msk.bf16.mxu0 %vm2424_vm0, %v2423_v1  ;;  %2221 = vmatpush3.bf16.msra.mxu0 %v2292_v43 }
0x1557   : > { %v1502_v60 = vpop.f32.mrf.mxu0 }
0x1558   : > { %1512 = vrot.lane.b32.xlu0 %v1502_v60, %s2426_s20 }
0x1559   : > { %v2212_v61 = vpop.f32.mrf.mxu0 }
0x15ca   : > { %v1513_v63 = vpop.permute.xlu0 %1512 }
0x15cb   : > { %v1515_v2 = vsel %vm844_vm3, %v1502_v60, %v1513_v63  ;;  %v1686_v60 = vrot.slane %v2687_v13, 3 }
0x15cc   : > { %v1516_v3 = vadd.f32 %v1515_v2, %v1510_v0 }
0x15ce   : > { %2341 = vtanh.f32 %v1516_v3  ;;  %v2076_v7 = vmul.f32 -1.442695, %v1516_v3 }
0x15d0   : > { %2343 = vpow2.f32 %v2076_v7 }
0x15db   : > { %v2342_v4 = vpop.eup %2341 }
0x15dc   : > { %1526 = vrot.lane.b32.xlu1 %v2342_v4, %s2427_s18  ;;  %v2083_v4 = vld [vmem:[%s2920_s9] ss:$0 sm:$0xff] }
0x15dd   : > { %v2344_v8 = vpop.eup %2343 }
0x15de   : > { %v1520_v9 = vadd.f32 1.0, %v2344_v8 }
0x15e0   : > { %2345 = vrcp.f32 %v1520_v9 }
0x15ed   : > { %v2346_v10 = vpop.eup %2345 }
0x15ee   : > { %v1524_v16 = vmul.f32 %v2346_v10, %v1424_v51 }
0x164e   : > { %v1527_v12 = vpop.permute.xlu1 %1526 }
0x164f   : > { %v1529_v14 = vmul.f32 %v2346_v10, %v1527_v12 }
0x1651   : > { %1531 = vrot.lane.b32.xlu0 %v1529_v14, %s2428_s29 }
0x16c3   : > { %v1532_v17 = vpop.permute.xlu0 %1531 }
0x16c4   : > { %v1534_v32 = vadd.f32 %v1532_v17, %v1524_v16  ;;  %v2430_v17 = vmov 0  }
0x16c5   : > { %2283 = vset.pattern.permute.xlu0 %v2430_v17 }
0x16c6   : > { %2347 = vtanh.f32 %v1534_v32 }
0x16d3   : > { %v2348_v19 = vpop.eup %2347 }
0x16d4   : > { %1537 = vrot.lane.b32.xlu1 %v2348_v19, %s2428_s29 }
0x16d8   : > { %1618 = vrot.lane.b32.xlu1 %v1616_v20, %s2426_s20 }
0x1746   : > { %v1538_v21 = vpop.permute.xlu1 %1537 }
0x1747   : > { %v1540_v22 = vmul.f32 %v2346_v10, %v1538_v21 }
0x1749   : > { %1542 = vrot.lane.b32.xlu0 %v1540_v22, %s2429_s16  ;;  %v1662_v18 = vrot.slane %v1540_v22, 2 }
0x174a   : > { %v1619_v26 = vpop.permute.xlu1 %1618 }
0x174b   : > { %v1621_v30 = vsel %vm844_vm3, %v1616_v20, %v1619_v26  ;;  %v1677_v48 = vsel %vm1676_vm9, %v2789_v57, %v1662_v18 }
0x17bb   : > { %v1543_v23 = vpop.permute.xlu0 %1542 }
0x17bc   : > { %2218 = vmatmul.mubr.msk.f32.vlgmr.msra.gmra.mxu1 %vm765_vm4, %v1543_v23 }
0x17bd   : > { %2228 = vmatprep.mubr.msk.bf16.mxu1 %vm2424_vm0, %v2423_v1  ;;  %2227 = vmatpush3.bf16.msra.mxu1 %v2291_v42 }
0x187c   : > { %v1612_v24 = vpop.f32.mrf.mxu1 }
0x187d   : > { %1623 = vrot.lane.b32.xlu0 %v1612_v24, %s2426_s20  ;;  %s523_s20 = sand.u32 1, %s2413_s19  }
0x187e   : > { %v2219_v25 = vpop.f32.mrf.mxu1  ;;  %s2844_s24 = sshll.u32 %s523_s20, 3  ;;  %s1885_s17 = scalar_lea.sflag [#allocation3], %s523_s20 }
0x18ef   : > { %v1624_v27 = vpop.permute.xlu0 %1623 }
0x18f0   : > { %v1626_v28 = vsel %vm844_vm3, %v1612_v24, %v1624_v27 }
0x18f1   : > { %v1627_v11 = vadd.f32 %v1626_v28, %v1621_v30 }
0x18f3   : > { %2349 = vtanh.f32 %v1627_v11  ;;  %v2078_v31 = vmul.f32 -1.442695, %v1627_v11 }
0x18f5   : > { %2351 = vpow2.f32 %v2078_v31 }
0x1900   : > { %v2350_v29 = vpop.eup %2349 }
0x1901   : > { %1637 = vrot.lane.b32.xlu1 %v2350_v29, %s2427_s18  ;;  %v2085_v29 = vld [vmem:[%s2921_s10] ss:$0 sm:$0xff] }
0x1902   : > { %v2352_v34 = vpop.eup %2351 }
0x1903   : > { %v1631_v35 = vadd.f32 1.0, %v2352_v34 }
0x1905   : > { %2353 = vrcp.f32 %v1631_v35 }
0x1912   : > { %v2354_v36 = vpop.eup %2353 }
0x1913   : > { %v1635_v38 = vmul.f32 %v2354_v36, %v1534_v32 }
0x1973   : > { %v1638_v58 = vpop.permute.xlu1 %1637 }
0x1974   : > { %v1640_v37 = vmul.f32 %v2354_v36, %v1638_v58 }
0x1976   : > { %1642 = vrot.lane.b32.xlu0 %v1640_v37, %s2428_s29 }
0x19e8   : > { %v1643_v39 = vpop.permute.xlu0 %1642 }
0x19e9   : > { %v1645_v40 = vadd.f32 %v1643_v39, %v1635_v38 }
0x19eb   : > { %2355 = vtanh.f32 %v1645_v40 }
0x19f8   : > { %v2356_v15 = vpop.eup %2355 }
0x19f9   : > { %1648 = vrot.lane.b32.xlu1 %v2356_v15, %s2428_s29  ;;  %s525_s29 = scalar_lea.vmem [#allocation2], %s2844_s24 }
0x19fa   : > { %s1904_s30 = sshll.u32 %s525_s29, 4  ;;  %s1905_s30 = int_to_ptr.vmem [resolvable:$true] %s1904_s30 }
0x19fb   : > { %p2368_p0 = scmp.lt.s32.totalorder %s1905_s30, %s2366_s1 }
0x1a6b   : > { %v1649_v44 = vpop.permute.xlu1 %1648 }
0x1a6c   : > { %v1651_v45 = vmul.f32 %v2354_v36, %v1649_v44 }
0x1a6e   : > { %v1665_v46 = vrot.slane %v1651_v45, 1 }
0x1a70   : > { %v1690_v50 = vsel %vm844_vm3, %v1665_v46, %v1540_v22  ;;  %v1679_v51 = vsel %vm1678_vm10, %v1677_v48, %v1665_v46 }
0x1a71   : > { %v1691_v52 = vsel %vm1668_vm5, %v1690_v50, %v1680_v47  ;;  %v1697_v54 = vpack.c.bf16 %v1679_v51, %v1679_v51 }
0x1a72   : > { %v1692_v59 = vsel %vm1670_vm6, %v1691_v52, %v1682_v49 }
0x1a73   : > { %1756 = vrot.lane.b32.xlu1 %v1697_v54, %s2429_s16  ;;  %v1693_v33 = vsel %vm1672_vm7, %v1692_v59, %v1656_v6  ;;  %v1816_v6 = vlaneseq }
0x1a74   : > { %v1694_v57 = vsel %vm1674_vm8, %v1693_v33, %v1684_v56 }
0x1a75   : > { %v1695_v61 = vsel %vm1676_vm9, %v1694_v57, %v1686_v60  ;;  %v1817_v2 = vand.u32 127, %v1816_v6 }
0x1a76   : > { %v1696_v41 = vsel %vm1678_vm10, %v1695_v61, %v1688_v55 }
0x1a77   : > { %v1700_v62 = vpack.c.bf16 %v1696_v41, %v1696_v41  ;;  %vm1818_vm11 = vcmp.lt.s32.totalorder %v1817_v2, 5 }
0x1a79   : > { %1704 = vrot.lane.b32.xlu0 %v1700_v62, %s2429_s16  ;;  %s2050_s16 = sshll.u32 %s2573_s25, 3 }
0x1a7a   : > { %s551_s26 = scalar_lea.vmem %s2923_s12, %s2050_s16  ;;  %s547_s23 = scalar_lea.vmem %s2922_s11, %s2050_s16 }
0x1a7b   : > { %v1831_v32 = vld [vmem:[%s551_s26] sm:$0xff]  ;;  %s2088_s26 = sshll.u32 %s2533_s22, 7 }
0x1a7c   : > { %v1852_v34 = vld [vmem:[%s547_s23] sm:$0xff]  ;;  %s1902_s18 = scalar_lea.hbm %s2924_s13, %s2088_s26  ;;  %s2361_s23 = scalar_lea.vmem %s1905_s30, 128 }
0x1a7d   : > { %vm1853_vm13 = vcmp.eq.s32.totalorder %v1852_v34, 1  ;;  %p2362_p11 = scmp.ne.s32.totalorder %s1905_s30, %s2361_s23  ;;  %p2369_p1 = scmp.lt.s32.totalorder %s2367_s2, %s2361_s23 }
0x1a7e   : > { %v2086_v36 = vsel %vm1853_vm13, 1.0, %v2423_v1 }
0x1a7f   : > { %p2363_p12 = pnand %p2362_p11, %p2550_p5  ;;  %p2370_p2 = por %p2369_p1, %p2368_p0 }
0x1a81   : > { %p2364_p13 = pneg %p2363_p12 }
0x1a83   : > { %p2371_p3 = pnand %p2370_p2, %p2364_p13 }
0x1ae5   : > { %v1757_v13 = vpop.permute.xlu1 %1756 }
0x1ae6   : > { %2229 = vmatmul.mubr.msk.bf16.vlgmr.msra.gmra.mxu1 %vm765_vm4, %v1757_v13 }
0x1aeb   : > { %v1705_v63 = vpop.permute.xlu0 %1704 }
0x1aec   : > { %2223 = vmatmul.mubr.msk.bf16.vlgmr.msra.gmra.mxu0 %vm765_vm4, %v1705_v63 }
0x1ba6   : > { %v1801_v5 = vpop.f32.mrf.mxu1 }
0x1ba8   : > { %v2230_v0 = vpop.f32.mrf.mxu1 }
0x1baa   : > { %v1804_v53 = vpop.f32.mrf.mxu1 }
0x1bac   : > { %v1749_v3 = vpop.f32.mrf.mxu0  ;;  %v2231_v7 = vpop.f32.mrf.mxu1 }
0x1bad   : > { %v1802_v8 = vadd.f32 %v1801_v5, %v1749_v3 }
0x1bae   : > { %v2224_v9 = vpop.f32.mrf.mxu0 }
0x1baf   : > { %v1814_v10 = vadd.f32 %v2083_v4, %v1802_v8 }
0x1bb0   : > { %v1752_v12 = vpop.f32.mrf.mxu0 }
0x1bb1   : > { %v1819_v14 = vsel %vm1818_vm11, %v1814_v10, -inf  ;;  %1815 = vst [vmem:[%s525_s29] sm:$0xff] %v1814_v10 }
0x1bb2   : > { %1820 = vmax.xlane.f32.xlu0 %v1819_v14  ;;  %v2225_v16 = vpop.f32.mrf.mxu0 }
0x1bc8   : > { %1833 = vperm.xlu0 %2283, %v1831_v32  }
0x1c3b   : > { %v1821_v19 = vpop.xlane.xlu0 %1820 }
0x1c3c   : > { %v1822_v20 = vsub.f32 %v1814_v10, %v1821_v19 }
0x1c3e   : > { %v1823_v21 = vmul.f32 1.442695, %v1822_v20 }
0x1c40   : > { %2357 = vpow2.f32 %v1823_v21 }
0x1c43   : > { %v1834_v25 = vpop.permute.xlu0 %1833 }
0x1c44   : > { %vm1835_vm12 = vcmp.eq.s32.totalorder %v1834_v25, %v1817_v2 }
0x1c45   : > { %v2084_v30 = vsel %vm1835_vm12, 1.0, %v2423_v1 }
0x1c46   : > { %v1849_v31 = vmul.f32 %v2085_v29, %v2084_v30 }
0x1c4d   : > { %v2358_v22 = vpop.eup %2357 }
0x1c4e   : > { %v1825_v23 = vsel %vm1818_vm11, %v2358_v22, 0.0 }
0x1c4f   : > { %1826 = vadd.xlane.f32.xlu1 %v1825_v23 }
0x1cd8   : > { %v1827_v24 = vpop.xlane.xlu1 %1826 }
0x1cd9   : > { %2359 = vlog2.f32 %v1827_v24 }
0x1ce6   : > { %v2360_v26 = vpop.eup %2359 }
0x1ce7   : > { %v1829_v27 = vmul.f32 0.6931472, %v2360_v26 }
0x1ce9   : > { %v1830_v28 = vsub.f32 %v1822_v20, %v1829_v27 }
0x1ceb   : > { %v1838_v11 = vmul.f32 %v2084_v30, %v1830_v28 }
0x1ced   : > { %1839 = vadd.xlane.f32.xlu1 %v1838_v11 }
0x1cf1   : > { %1850 = vadd.xlane.f32.xlu1 %v1849_v31 }
0x1d76   : > { %v1840_v35 = vpop.xlane.xlu1 %1839 }
0x1d77   : > { %v1841_v37 = vsub.f32 0.0, %v1840_v35 }
0x1d7a   : > { %v1851_v58 = vpop.xlane.xlu1 %1850 }
0x1d7b   : > { %v1856_v38 = vmul.f32 %v2086_v36, %v1851_v58 }
0x1d7d   : > { %v1857_v39 = vmul.f32 %v1856_v38, %v1841_v37  ;;  %v1872_v15 = vsel %vm1858_vm14, %v1856_v38, 0.0 }
0x1d7f   : > { %v1859_v40 = vsel %vm1858_vm14, %v1857_v39, 0.0 }
0x1d80   : > { %1860 = vadd.xlane.f32.xlu1 %v1859_v40 }
0x1d84   : > { %1873 = vadd.xlane.f32.xlu1 %v1872_v15 }
0x1d85   : > { %2374 = shalt.err (!%p2371_p3)
}
0x1d86   : > { %s2375_s22 = scalar_lea.hbm %s1902_s18, 128  ;;  %s2379_s29 = scalar_lea.hbm %s2924_s13, 256 }
0x1d87   : > { %p2376_p4 = scmp.ne.s32.totalorder %s1902_s18, %s2375_s22  ;;  %p2380_p9 = scmp.lt.s32.totalorder %s1902_s18, %s2924_s13 }
0x1d88   : > { %p2381_p10 = scmp.lt.s32.totalorder %s2379_s29, %s2375_s22 }
0x1d89   : > { %p2377_p7 = pnand %p2376_p4, %p2550_p5 }
0x1d8a   : > { %p2382_p11 = por %p2381_p10, %p2380_p9 }
0x1d8b   : > { %p2378_p8 = pneg %p2377_p7 }
0x1d8d   : > { %p2383_p12 = pnand %p2382_p11, %p2378_p8 }
0x1d8f   : > { %2386 = shalt.err (!%p2383_p12)
}
0x1d90   : > { %2236 = dma.vmem_to_hbm [thread:$0]  (%p2550_p5), %s1905_s30, 128, %s1902_s18, %s1885_s17   ;;  %vm1870_vm15 = vcmask 0  }
0x1d91   : > { %s554_s2 = scalar_lea.vmem %s2925_s14, %s2573_s25  ;;  %s557_s18 = scalar_lea.vmem %s2926_s15, %s2573_s25 }
0x1e09   : > { %v1861_v1 = vpop.xlane.xlu1 %1860 }
0x1e0a   : > { %v1862_v42 = vrot.slane %v1861_v1, 4 }
0x1e0c   : > { %v1863_v43 = vadd.f32 %v1862_v42, %v1861_v1 }
0x1e0d   : > { %v1874_v18 = vpop.xlane.xlu1 %1873 }
0x1e0e   : > { %v1864_v44 = vrot.slane %v1863_v43, 2  ;;  %v1875_v45 = vrot.slane %v1874_v18, 4 }
0x1e10   : > { %v1876_v46 = vadd.f32 %v1875_v45, %v1874_v18  ;;  %v1865_v47 = vadd.f32 %v1864_v44, %v1863_v43 }
0x1e12   : > { %v1877_v48 = vrot.slane %v1876_v46, 2  ;;  %v1866_v49 = vrot.slane %v1865_v47, 1 }
0x1e14   : > { %v1878_v50 = vadd.f32 %v1877_v48, %v1876_v46  ;;  %v1867_v51 = vadd.f32 %v1866_v49, %v1865_v47 }
0x1e16   : > { %2232 = vpush %v1867_v51  ;;  %v1879_v52 = vrot.slane %v1878_v50, 1 }
0x1e18   : > { %v1880_v54 = vadd.f32 %v1879_v52, %v1878_v50 }
0x1e1a   : > { %2234 = vpush %v1880_v54 }
0x1e47   : > { %s2233_s28 = spop %2232 }
0x1e48   : > { %v1869_v56 = vstv %s2233_s28 }
0x1e49   : > { %1871 = vst.msk [vmem:[%s554_s2] sm:$0x1] %vm1870_vm15, %v1869_v56 }
0x1e4b   : > { %s2235_s17 = spop %2234 }
0x1e4c   : > { %v1882_v59 = vstv %s2235_s17 }
0x1e4d   : > { %1883 = vst.msk [vmem:[%s557_s18] sm:$0x1] %vm1870_vm15, %v1882_v59 }
0x1e4e PF: > { %s2945_s23 = sld [smem:[#allocation5_spill]]  ;;  %p2242_p5 = scmp.ge.s32.totalorder %s2421_s21, 2 }
0x1e50   : > { %p2239_p13 = pnand %p2242_p5, %p2554_p6 }
0x1e52   : > { %p2240_p0 = pneg %p2239_p13 }
0x1e54   : > { %s1922_s20 = sand.u32 1, %s2945_s23  }
0x1e55   : > { %s1923_s24 = scalar_lea.sflag [#allocation3], %s1922_s20 }
0x1e56   : > { %2404 = dma.done.wait (%p2240_p0), %s1923_s24, 128  }
0x1e57   : > { %2406 = vsyncadd (%p2240_p0), %s1923_s24, 4294967168  ;;  %s2947_s21 = sld [smem:[#allocation7_spill]]  ;;  %s2950_s18 = smov %s2413_s19 }
0x1e58   : > { %s2948_s29 = sld [smem:[#allocation6_spill]] }
0x1e59   : > { %s2949_s20 = sld [smem:[#allocation8_spill]] }
0x1e5d   : > { %p26_p1 = scmp.ge.s32.totalorder %s2947_s21, 4  }
0x1e5e   : > { %s2951_s19 = smov %s2948_s29 }
0x1e5f   :  { %28 = sbr.rel (!%p26_p1) target bundleno = 7 (0x7), region = 140 }
0x1e64   :  { %1940 = vsyncpa [#allocation3], 1 }
0x1e65   :  { %1942 = vsyncpa [#allocation3 + $0x1], 1 }

</bundles_post_ra>
